<compile_context>
chip_gen: v6e
topology: v6e:2x2x1
jax: 0.10.0
libtpu: 0.0.40
codegen_flags: <defaults>
</compile_context>

<pallas_src>
import functools

import jax
import jax.numpy as jnp
import numpy as np
from jax.experimental import pallas as pl
from jax.experimental.pallas import tpu as pltpu

_NEG_BIG = -1e30  # finite "-inf" so exp(m_old - m_new) is well defined at k == 0
_LABEL_SENTINEL = np.iinfo(np.int32).min


def _round_up(x, m):
    return ((x + m - 1) // m) * m


def _supcon_kernel(a_ref, ct_ref, al_ref, cl_ref, cbias_ref, out_ref,
                   m_scr, l_scr, ps_scr, pc_scr,
                   *, temp_over_base, block_m, block_k):
    i = pl.program_id(0)           # anchor-row tile ("parallel")
    k = pl.program_id(1)           # contrast-column tile (reduction, innermost)

    @pl.when(k == 0)
    def _init():
        m_scr[...] = jnp.full_like(m_scr, _NEG_BIG)
        l_scr[...] = jnp.zeros_like(l_scr)
        ps_scr[...] = jnp.zeros_like(ps_scr)
        pc_scr[...] = jnp.zeros_like(pc_scr)

    # Scaled scores for this tile: (A/T) @ C^T with f32 accumulation on the MXU.
    # The 1/T scale and the feat-dim zero padding are folded into the operands
    # in the wrapper, so no per-element work is needed here.
    s = jnp.dot(a_ref[...], ct_ref[...], preferred_element_type=jnp.float32)

    # Padding columns: additive bias (0 for real columns, -1e30 for padding).
    # Padded contrast labels hold a sentinel, so the equality below is False
    # there without any extra masking.
    s_b = s + cbias_ref[...]
    pos_f = (al_ref[...] == cl_ref[...]).astype(jnp.float32)

    def accumulate(s_tile, pos_tile):
        # Online log-sum-exp over valid columns; exp underflows to exactly 0
        # at the -1e30-masked positions, so no extra mask multiply is needed.
        m_old = m_scr[...]
        m_new = jnp.maximum(m_old, jnp.max(s_tile, axis=1, keepdims=True))
        alpha = jnp.exp(m_old - m_new)
        l_scr[...] = alpha * l_scr[...] + jnp.sum(jnp.exp(s_tile - m_new),
                                                  axis=1, keepdims=True)
        m_scr[...] = m_new
        # Positive-pair accumulators (raw scaled scores; m cancels analytically).
        # pos_tile is already 0 at self/padding, so the masked s values never leak.
        ps_scr[...] += jnp.sum(pos_tile * s_tile, axis=1, keepdims=True)
        pc_scr[...] += jnp.sum(pos_tile, axis=1, keepdims=True)

    # Only tiles intersecting the global diagonal need the self-exclusion
    # (2-D iotas + compare); everything else runs the cheap path.
    row0 = i * block_m
    col0 = k * block_k
    overlap = jnp.logical_and(row0 < col0 + block_k, col0 < row0 + block_m)

    @pl.when(jnp.logical_not(overlap))
    def _off_diag():
        accumulate(s_b, pos_f)

    @pl.when(overlap)
    def _on_diag():
        rows = row0 + jax.lax.broadcasted_iota(jnp.int32, (block_m, block_k), 0)
        cols = col0 + jax.lax.broadcasted_iota(jnp.int32, (block_m, block_k), 1)
        not_self = rows != cols
        accumulate(jnp.where(not_self, s_b, jnp.float32(_NEG_BIG)),
                   jnp.where(not_self, pos_f, 0.0))

    @pl.when(k == pl.num_programs(1) - 1)
    def _finish():
        log_denom = m_scr[...] + jnp.log(l_scr[...])     # log sum_{valid} exp(s)
        # NOTE: rows with zero positives give 0/0 = NaN, matching PyTorch
        # SupConLoss (a single unpaired label poisons the scalar mean).
        mean_log_prob_pos = (ps_scr[...] - pc_scr[...] * log_denom) / pc_scr[...]
        out_ref[...] = (-temp_over_base) * mean_log_prob_pos


def supcon_loss(features, labels=None, mask=None, *,
                temperature=0.07, contrast_mode='all', base_temperature=0.07,
                block_m=512, block_k=512, compute_dtype=jnp.bfloat16):
    """Forward pass of SupConLoss (SimCLR when labels is None)."""
    if features.ndim < 3:
        raise ValueError('`features` needs to be [bsz, n_views, ...], '
                         'at least 3 dimensions are required')
    if features.ndim > 3:
        features = features.reshape(features.shape[0], features.shape[1], -1)
    batch_size, n_views, feat_dim = features.shape

    if labels is not None and mask is not None:
        raise ValueError('Cannot define both `labels` and `mask`')
    if mask is not None:
        # TODO(synk): arbitrary (possibly asymmetric / non-binary) [bsz, bsz] mask
        # has no label-equality form; it falls back to the plain-JAX path. The
        # labels / SimCLR paths below run the Pallas kernel.
        return _supcon_loss_ref(features, mask=mask, temperature=temperature,
                                contrast_mode=contrast_mode,
                                base_temperature=base_temperature)

    if labels is None:
        label_ids = jnp.arange(batch_size, dtype=jnp.int32)   # SimCLR: same sample
    else:
        labels = jnp.asarray(labels).reshape(-1)
        if labels.shape[0] != batch_size:
            raise ValueError('Num of labels does not match num of features')
        label_ids = labels.astype(jnp.int32)

    # torch.cat(torch.unbind(features, dim=1), dim=0): view-major stacking
    contrast_feature = jnp.concatenate(
        [features[:, v] for v in range(n_views)], axis=0)     # [V*B, D]
    contrast_labels = jnp.tile(label_ids, n_views)             # [V*B]

    if contrast_mode == 'one':
        anchor_feature, anchor_labels, anchor_count = features[:, 0], label_ids, 1
    elif contrast_mode == 'all':
        anchor_feature, anchor_labels, anchor_count = (
            contrast_feature, contrast_labels, n_views)
    else:
        raise ValueError('Unknown mode: {}'.format(contrast_mode))

    n_anchor = anchor_count * batch_size
    n_contrast = n_views * batch_size

    # Tile sizes: lane-dense (multiple of 128) on the contrast axis, multiple
    # of 8 on the anchor axis; shrink to the (padded) problem if it is small.
    tm = max(8, min(block_m, _round_up(n_anchor, 8)))
    # Keep >= 2 anchor blocks when possible so the "parallel" axis can shard
    # across both TensorCores on v7x (megacore).
    if n_anchor > 8 and _round_up(n_anchor, tm) // tm < 2:
        tm = max(8, _round_up(-(-n_anchor // 2), 8))
    tk = min(block_k, _round_up(n_contrast, 128))
    na_pad = _round_up(n_anchor, tm)
    nc_pad = _round_up(n_contrast, tk)
    d_pad = _round_up(feat_dim, 128)   # dense MXU feed / DMA; zero cols are free

    inv_temp = float(1.0 / temperature)

    # MXU operands: 1/T folded into the anchor, contrast pre-transposed to
    # [D, Nc] (no in-kernel transpose). Padded feature columns are zero (do not
    # change the dot); padded contrast columns get a -1e30 bias and a sentinel
    # label so they never count as valid or positive.
    a = jnp.zeros((na_pad, d_pad), compute_dtype).at[:n_anchor, :feat_dim].set(
        (anchor_feature.astype(jnp.float32) * inv_temp).astype(compute_dtype))
    ct = jnp.zeros((d_pad, nc_pad), compute_dtype).at[:feat_dim, :n_contrast].set(
        contrast_feature.T.astype(compute_dtype))
    al = jnp.zeros((na_pad, 1), jnp.int32).at[:n_anchor, 0].set(anchor_labels)
    cl = jnp.full((1, nc_pad), _LABEL_SENTINEL, jnp.int32).at[0, :n_contrast].set(
        contrast_labels)
    cbias = jnp.full((1, nc_pad), _NEG_BIG, jnp.float32).at[0, :n_contrast].set(0.0)

    grid = (na_pad // tm, nc_pad // tk)
    kernel = functools.partial(
        _supcon_kernel,
        temp_over_base=float(temperature / base_temperature),
        block_m=tm, block_k=tk)

    itemsize = jnp.dtype(compute_dtype).itemsize
    out = pl.pallas_call(
        kernel,
        out_shape=jax.ShapeDtypeStruct((na_pad, 1), jnp.float32),
        grid_spec=pltpu.PrefetchScalarGridSpec(
            num_scalar_prefetch=0,
            grid=grid,
            in_specs=[
                pl.BlockSpec((tm, d_pad), lambda i, k: (i, 0)),   # anchor tile (resident over k)
                pl.BlockSpec((d_pad, tk), lambda i, k: (0, k)),   # contrast^T tile
                pl.BlockSpec((tm, 1), lambda i, k: (i, 0)),       # anchor labels
                pl.BlockSpec((1, tk), lambda i, k: (0, k)),       # contrast labels (+sentinel pad)
                pl.BlockSpec((1, tk), lambda i, k: (0, k)),       # padding bias row
            ],
            out_specs=pl.BlockSpec((tm, 1), lambda i, k: (i, 0)),  # per-anchor loss
            scratch_shapes=[pltpu.VMEM((tm, 1), jnp.float32)] * 4,  # m, l, ps, pc
        ),
        compiler_params=pltpu.CompilerParams(
            dimension_semantics=("parallel", "arbitrary"),
            vmem_limit_bytes=48 * 1024 * 1024),
        cost_estimate=pl.CostEstimate(
            flops=2 * na_pad * nc_pad * d_pad,
            transcendentals=na_pad * nc_pad,
            bytes_accessed=(na_pad * d_pad * itemsize          # anchor read once
                            + d_pad * nc_pad * itemsize * grid[0]  # C^T re-streamed per anchor tile
                            + (na_pad + 2 * nc_pad) * 4        # labels + bias
                            + na_pad * 4)),                    # output
    )(a, ct, al, cl, cbias)

    # loss.view(anchor_count, batch_size).mean() == mean over all real anchors
    return jnp.mean(out[:n_anchor, 0])


def _supcon_loss_ref(features, labels=None, mask=None, *, temperature=0.07,
                     contrast_mode='all', base_temperature=0.07):
    """Pure-jnp reference mirroring the PyTorch forward (f32, HIGHEST precision)."""
    if features.ndim > 3:
        features = features.reshape(features.shape[0], features.shape[1], -1)
    B, V, D = features.shape
    if labels is None and mask is None:
        mask = jnp.eye(B, dtype=jnp.float32)
    elif labels is not None:
        labels = jnp.asarray(labels).reshape(-1, 1)
        mask = (labels == labels.T).astype(jnp.float32)
    else:
        mask = jnp.asarray(mask, jnp.float32)
    contrast_feature = jnp.concatenate([features[:, v] for v in range(V)], axis=0)
    if contrast_mode == 'one':
        anchor_feature, anchor_count = features[:, 0], 1
    else:
        anchor_feature, anchor_count = contrast_feature, V
    s = jnp.dot(anchor_feature, contrast_feature.T,
                precision=jax.lax.Precision.HIGHEST) / temperature
    logits = s - jnp.max(s, axis=1, keepdims=True)
    mask = jnp.tile(mask, (anchor_count, V))
    na = anchor_count * B
    logits_mask = jnp.ones((na, V * B), jnp.float32).at[
        jnp.arange(na), jnp.arange(na)].set(0.0)
    mask = mask * logits_mask
    exp_logits = jnp.exp(logits) * logits_mask
    log_prob = logits - jnp.log(exp_logits.sum(1, keepdims=True))
    mean_log_prob_pos = (mask * log_prob).sum(1) / mask.sum(1)
    loss = -(temperature / base_temperature) * mean_log_prob_pos
    return loss.reshape(anchor_count, B).mean()


if __name__ == "__main__":
    key = jax.random.PRNGKey(0)
    k_feat, k_lbl = jax.random.split(key)

    bsz, n_views, feat_dim = 96, 2, 64
    features = jax.random.normal(k_feat, (bsz, n_views, feat_dim), dtype=jnp.float32)
    features = features / jnp.linalg.norm(features, axis=-1, keepdims=True)
    labels = jax.random.randint(k_lbl, (bsz,), 0, 10, dtype=jnp.int32)

    # Small tiles -> a real (3, 2) grid exercising online LSE, column padding
    # and the diagonal / off-diagonal tile branches.
    loss_sup = jax.block_until_ready(
        supcon_loss(features, labels=labels, block_m=64, block_k=128))
    loss_simclr = jax.block_until_ready(
        supcon_loss(features, block_m=64, block_k=128))
    loss_one = jax.block_until_ready(
        supcon_loss(features, labels=labels, contrast_mode='one',
                    block_m=64, block_k=128))
    # Default tiles (2 anchor blocks via the megacore heuristic) with f32 MXU
    # operands for extra coverage.
    loss_f32 = jax.block_until_ready(
        supcon_loss(features, labels=labels, compute_dtype=jnp.float32))

    ref_sup = _supcon_loss_ref(features, labels=labels)
    ref_simclr = _supcon_loss_ref(features)
    ref_one = _supcon_loss_ref(features, labels=labels, contrast_mode='one')

    tol = dict(rtol=5e-2, atol=5e-2)   # bf16 MXU operands vs f32 reference
    np.testing.assert_allclose(np.asarray(loss_sup), np.asarray(ref_sup), **tol)
    np.testing.assert_allclose(np.asarray(loss_simclr), np.asarray(ref_simclr), **tol)
    np.testing.assert_allclose(np.asarray(loss_one), np.asarray(ref_one), **tol)
    np.testing.assert_allclose(np.asarray(loss_f32), np.asarray(ref_sup), **tol)
    print("KERNEL_OK")
</pallas_src>

<mosaic_0001>
module attributes {stable_mosaic.version = 11 : i64} {
  func.func @_supcon_kernel(%arg0: i32, %arg1: i32, %arg2: memref<64x128xbf16, #tpu.memory_space<vmem>>, %arg3: memref<128x128xbf16, #tpu.memory_space<vmem>>, %arg4: memref<64x1xi32, #tpu.memory_space<vmem>>, %arg5: memref<1x128xi32, #tpu.memory_space<vmem>>, %arg6: memref<1x128xf32, #tpu.memory_space<vmem>>, %arg7: memref<64x1xf32, #tpu.memory_space<vmem>>, %arg8: memref<64x1xf32, #tpu.memory_space<vmem>>, %arg9: memref<64x1xf32, #tpu.memory_space<vmem>>, %arg10: memref<64x1xf32, #tpu.memory_space<vmem>>, %arg11: memref<64x1xf32, #tpu.memory_space<vmem>>) attributes {dimension_semantics = [#tpu.dimension_semantics<parallel>, #tpu.dimension_semantics<arbitrary>], iteration_bounds = array<i64: 3, 2>, scalar_prefetch = 0 : i64, scratch_operands = 4 : i64, tpu.core_type = #tpu.core_type<tc>, window_params = [{transform_indices = @transform_0, window_bounds = array<i64: 64, 128>}, {transform_indices = @transform_1, window_bounds = array<i64: 128, 128>}, {transform_indices = @transform_2, window_bounds = array<i64: 64, 1>}, {transform_indices = @transform_3, window_bounds = array<i64: 1, 128>}, {transform_indices = @transform_4, window_bounds = array<i64: 1, 128>}, {transform_indices = @transform_5, window_bounds = array<i64: 64, 1>}]} {
    %c0_i32 = arith.constant 0 : i32
    %0 = arith.cmpi eq, %arg1, %c0_i32 : i32
    %1 = arith.extui %0 : i1 to i32
    %c0_i32_0 = arith.constant 0 : i32
    %2 = arith.cmpi ne, %1, %c0_i32_0 : i32
    scf.if %2 {
      %cst_15 = arith.constant -1.000000e+30 : f32
      %31 = vector.broadcast %cst_15 : f32 to vector<64x1xf32>
      %c0_16 = arith.constant 0 : index
      %c0_17 = arith.constant 0 : index
      %32 = vector.load %arg8[%c0_16, %c0_17] : memref<64x1xf32, #tpu.memory_space<vmem>>, vector<64x1xf32>
      tpu.vector_store %arg8[%c0_16, %c0_17], %31 {strides = array<i32>} : memref<64x1xf32, #tpu.memory_space<vmem>>, vector<64x1xf32>,
      %cst_18 = arith.constant 0.000000e+00 : f32
      %33 = vector.broadcast %cst_18 : f32 to vector<64x1xf32>
      %c0_19 = arith.constant 0 : index
      %c0_20 = arith.constant 0 : index
      %34 = vector.load %arg9[%c0_19, %c0_20] : memref<64x1xf32, #tpu.memory_space<vmem>>, vector<64x1xf32>
      tpu.vector_store %arg9[%c0_19, %c0_20], %33 {strides = array<i32>} : memref<64x1xf32, #tpu.memory_space<vmem>>, vector<64x1xf32>,
      %cst_21 = arith.constant 0.000000e+00 : f32
      %35 = vector.broadcast %cst_21 : f32 to vector<64x1xf32>
      %c0_22 = arith.constant 0 : index
      %c0_23 = arith.constant 0 : index
      %36 = vector.load %arg10[%c0_22, %c0_23] : memref<64x1xf32, #tpu.memory_space<vmem>>, vector<64x1xf32>
      tpu.vector_store %arg10[%c0_22, %c0_23], %35 {strides = array<i32>} : memref<64x1xf32, #tpu.memory_space<vmem>>, vector<64x1xf32>,
      %cst_24 = arith.constant 0.000000e+00 : f32
      %37 = vector.broadcast %cst_24 : f32 to vector<64x1xf32>
      %c0_25 = arith.constant 0 : index
      %c0_26 = arith.constant 0 : index
      %38 = vector.load %arg11[%c0_25, %c0_26] : memref<64x1xf32, #tpu.memory_space<vmem>>, vector<64x1xf32>
      tpu.vector_store %arg11[%c0_25, %c0_26], %37 {strides = array<i32>} : memref<64x1xf32, #tpu.memory_space<vmem>>, vector<64x1xf32>,
    } else {
    }
    %c0 = arith.constant 0 : index
    %c0_1 = arith.constant 0 : index
    %3 = vector.load %arg2[%c0, %c0_1] : memref<64x128xbf16, #tpu.memory_space<vmem>>, vector<64x128xbf16>
    %c0_2 = arith.constant 0 : index
    %c0_3 = arith.constant 0 : index
    %4 = vector.load %arg3[%c0_2, %c0_3] : memref<128x128xbf16, #tpu.memory_space<vmem>>, vector<128x128xbf16>
    %cst = arith.constant dense<0.000000e+00> : vector<64x128xf32>
    %5 = tpu.matmul %3, %4, %cst {dimension_numbers = #tpu.dot_dimension_numbers<[1], [0], [0], [1], [0, 0, 1, 1], [], []>} : vector<64x128xbf16>, vector<128x128xbf16>, vector<64x128xf32> -> vector<64x128xf32>
    %c0_4 = arith.constant 0 : index
    %c0_5 = arith.constant 0 : index
    %6 = vector.load %arg6[%c0_4, %c0_5] : memref<1x128xf32, #tpu.memory_space<vmem>>, vector<1x128xf32>
    %7 = vector.broadcast %6 : vector<1x128xf32> to vector<64x128xf32>
    %8 = arith.addf %5, %7 : vector<64x128xf32>
    %c0_6 = arith.constant 0 : index
    %c0_7 = arith.constant 0 : index
    %9 = vector.load %arg4[%c0_6, %c0_7] : memref<64x1xi32, #tpu.memory_space<vmem>>, vector<64x1xi32>
    %c0_8 = arith.constant 0 : index
    %c0_9 = arith.constant 0 : index
    %10 = vector.load %arg5[%c0_8, %c0_9] : memref<1x128xi32, #tpu.memory_space<vmem>>, vector<1x128xi32>
    %11 = vector.broadcast %9 : vector<64x1xi32> to vector<64x128xi32>
    %12 = vector.broadcast %10 : vector<1x128xi32> to vector<64x128xi32>
    %13 = arith.cmpi eq, %11, %12 : vector<64x128xi32>
    %14 = arith.extui %13 : vector<64x128xi1> to vector<64x128xi32>
    %15 = arith.sitofp %14 : vector<64x128xi32> to vector<64x128xf32>
    %c64_i32 = arith.constant 64 : i32
    %16 = arith.muli %arg0, %c64_i32 : i32
    %c128_i32 = arith.constant 128 : i32
    %17 = arith.muli %arg1, %c128_i32 : i32
    %c128_i32_10 = arith.constant 128 : i32
    %18 = arith.addi %17, %c128_i32_10 : i32
    %19 = arith.cmpi slt, %16, %18 : i32
    %c64_i32_11 = arith.constant 64 : i32
    %20 = arith.addi %16, %c64_i32_11 : i32
    %21 = arith.cmpi slt, %17, %20 : i32
    %22 = arith.andi %19, %21 : i1
    %true = arith.constant true
    %23 = arith.xori %22, %true : i1
    %24 = arith.extui %23 : i1 to i32
    %c0_i32_12 = arith.constant 0 : i32
    %25 = arith.cmpi ne, %24, %c0_i32_12 : i32
    scf.if %25 {
      %c0_15 = arith.constant 0 : index
      %c0_16 = arith.constant 0 : index
      %31 = vector.load %arg8[%c0_15, %c0_16] : memref<64x1xf32, #tpu.memory_space<vmem>>, vector<64x1xf32>
      %cst_17 = arith.constant dense<0xFF800000> : vector<64xf32>
      %32 = vector.multi_reduction <maximumf>, %8, %cst_17 [1] : vector<64x128xf32> to vector<64xf32>
      %33 = vector.shape_cast %32 : vector<64xf32> to vector<64x1xf32>
      %34 = arith.maximumf %31, %33 : vector<64x1xf32>
      %35 = arith.subf %31, %34 : vector<64x1xf32>
      %36 = math.exp %35 : vector<64x1xf32>
      %c0_18 = arith.constant 0 : index
      %c0_19 = arith.constant 0 : index
      %37 = vector.load %arg9[%c0_18, %c0_19] : memref<64x1xf32, #tpu.memory_space<vmem>>, vector<64x1xf32>
      %38 = arith.mulf %36, %37 : vector<64x1xf32>
      %39 = vector.broadcast %34 : vector<64x1xf32> to vector<64x128xf32>
      %40 = arith.subf %8, %39 : vector<64x128xf32>
      %41 = math.exp %40 : vector<64x128xf32>
      %cst_20 = arith.constant dense<0.000000e+00> : vector<64xf32>
      %42 = vector.multi_reduction <add>, %41, %cst_20 [1] : vector<64x128xf32> to vector<64xf32>
      %43 = vector.shape_cast %42 : vector<64xf32> to vector<64x1xf32>
      %44 = arith.addf %38, %43 : vector<64x1xf32>
      %c0_21 = arith.constant 0 : index
      %c0_22 = arith.constant 0 : index
      %45 = vector.load %arg9[%c0_21, %c0_22] : memref<64x1xf32, #tpu.memory_space<vmem>>, vector<64x1xf32>
      tpu.vector_store %arg9[%c0_21, %c0_22], %44 {strides = array<i32>} : memref<64x1xf32, #tpu.memory_space<vmem>>, vector<64x1xf32>,
      %c0_23 = arith.constant 0 : index
      %c0_24 = arith.constant 0 : index
      %46 = vector.load %arg8[%c0_23, %c0_24] : memref<64x1xf32, #tpu.memory_space<vmem>>, vector<64x1xf32>
      tpu.vector_store %arg8[%c0_23, %c0_24], %34 {strides = array<i32>} : memref<64x1xf32, #tpu.memory_space<vmem>>, vector<64x1xf32>,
      %c0_25 = arith.constant 0 : index
      %c0_26 = arith.constant 0 : index
      %47 = vector.load %arg10[%c0_25, %c0_26] : memref<64x1xf32, #tpu.memory_space<vmem>>, vector<64x1xf32>
      %48 = arith.mulf %15, %8 : vector<64x128xf32>
      %cst_27 = arith.constant dense<0.000000e+00> : vector<64xf32>
      %49 = vector.multi_reduction <add>, %48, %cst_27 [1] : vector<64x128xf32> to vector<64xf32>
      %50 = vector.shape_cast %49 : vector<64xf32> to vector<64x1xf32>
      %51 = arith.addf %47, %50 : vector<64x1xf32>
      %c0_28 = arith.constant 0 : index
      %c0_29 = arith.constant 0 : index
      %52 = vector.load %arg10[%c0_28, %c0_29] : memref<64x1xf32, #tpu.memory_space<vmem>>, vector<64x1xf32>
      tpu.vector_store %arg10[%c0_28, %c0_29], %51 {strides = array<i32>} : memref<64x1xf32, #tpu.memory_space<vmem>>, vector<64x1xf32>,
      %c0_30 = arith.constant 0 : index
      %c0_31 = arith.constant 0 : index
      %53 = vector.load %arg11[%c0_30, %c0_31] : memref<64x1xf32, #tpu.memory_space<vmem>>, vector<64x1xf32>
      %cst_32 = arith.constant dense<0.000000e+00> : vector<64xf32>
      %54 = vector.multi_reduction <add>, %15, %cst_32 [1] : vector<64x128xf32> to vector<64xf32>
      %55 = vector.shape_cast %54 : vector<64xf32> to vector<64x1xf32>
      %56 = arith.addf %53, %55 : vector<64x1xf32>
      %c0_33 = arith.constant 0 : index
      %c0_34 = arith.constant 0 : index
      %57 = vector.load %arg11[%c0_33, %c0_34] : memref<64x1xf32, #tpu.memory_space<vmem>>, vector<64x1xf32>
      tpu.vector_store %arg11[%c0_33, %c0_34], %56 {strides = array<i32>} : memref<64x1xf32, #tpu.memory_space<vmem>>, vector<64x1xf32>,
    } else {
    }
    %26 = arith.extui %22 : i1 to i32
    %c0_i32_13 = arith.constant 0 : i32
    %27 = arith.cmpi ne, %26, %c0_i32_13 : i32
    scf.if %27 {
      %31 = tpu.iota {dimensions = array<i32: 0>} : vector<64x128xi32>
      %32 = vector.broadcast %16 : i32 to vector<64x128xi32>
      %33 = arith.addi %32, %31 : vector<64x128xi32>
      %34 = tpu.iota {dimensions = array<i32: 1>} : vector<64x128xi32>
      %35 = vector.broadcast %17 : i32 to vector<64x128xi32>
      %36 = arith.addi %35, %34 : vector<64x128xi32>
      %37 = arith.cmpi ne, %33, %36 : vector<64x128xi32>
      %cst_15 = arith.constant -1.000000e+30 : f32
      %38 = vector.broadcast %cst_15 : f32 to vector<64x128xf32>
      %39 = arith.select %37, %8, %38 : vector<64x128xi1>, vector<64x128xf32>
      %cst_16 = arith.constant 0.000000e+00 : f32
      %40 = vector.broadcast %cst_16 : f32 to vector<64x128xf32>
      %41 = arith.select %37, %15, %40 : vector<64x128xi1>, vector<64x128xf32>
      %c0_17 = arith.constant 0 : index
      %c0_18 = arith.constant 0 : index
      %42 = vector.load %arg8[%c0_17, %c0_18] : memref<64x1xf32, #tpu.memory_space<vmem>>, vector<64x1xf32>
      %cst_19 = arith.constant dense<0xFF800000> : vector<64xf32>
      %43 = vector.multi_reduction <maximumf>, %39, %cst_19 [1] : vector<64x128xf32> to vector<64xf32>
      %44 = vector.shape_cast %43 : vector<64xf32> to vector<64x1xf32>
      %45 = arith.maximumf %42, %44 : vector<64x1xf32>
      %46 = arith.subf %42, %45 : vector<64x1xf32>
      %47 = math.exp %46 : vector<64x1xf32>
      %c0_20 = arith.constant 0 : index
      %c0_21 = arith.constant 0 : index
      %48 = vector.load %arg9[%c0_20, %c0_21] : memref<64x1xf32, #tpu.memory_space<vmem>>, vector<64x1xf32>
      %49 = arith.mulf %47, %48 : vector<64x1xf32>
      %50 = vector.broadcast %45 : vector<64x1xf32> to vector<64x128xf32>
      %51 = arith.subf %39, %50 : vector<64x128xf32>
      %52 = math.exp %51 : vector<64x128xf32>
      %cst_22 = arith.constant dense<0.000000e+00> : vector<64xf32>
      %53 = vector.multi_reduction <add>, %52, %cst_22 [1] : vector<64x128xf32> to vector<64xf32>
      %54 = vector.shape_cast %53 : vector<64xf32> to vector<64x1xf32>
      %55 = arith.addf %49, %54 : vector<64x1xf32>
      %c0_23 = arith.constant 0 : index
      %c0_24 = arith.constant 0 : index
      %56 = vector.load %arg9[%c0_23, %c0_24] : memref<64x1xf32, #tpu.memory_space<vmem>>, vector<64x1xf32>
      tpu.vector_store %arg9[%c0_23, %c0_24], %55 {strides = array<i32>} : memref<64x1xf32, #tpu.memory_space<vmem>>, vector<64x1xf32>,
      %c0_25 = arith.constant 0 : index
      %c0_26 = arith.constant 0 : index
      %57 = vector.load %arg8[%c0_25, %c0_26] : memref<64x1xf32, #tpu.memory_space<vmem>>, vector<64x1xf32>
      tpu.vector_store %arg8[%c0_25, %c0_26], %45 {strides = array<i32>} : memref<64x1xf32, #tpu.memory_space<vmem>>, vector<64x1xf32>,
      %c0_27 = arith.constant 0 : index
      %c0_28 = arith.constant 0 : index
      %58 = vector.load %arg10[%c0_27, %c0_28] : memref<64x1xf32, #tpu.memory_space<vmem>>, vector<64x1xf32>
      %59 = arith.mulf %41, %39 : vector<64x128xf32>
      %cst_29 = arith.constant dense<0.000000e+00> : vector<64xf32>
      %60 = vector.multi_reduction <add>, %59, %cst_29 [1] : vector<64x128xf32> to vector<64xf32>
      %61 = vector.shape_cast %60 : vector<64xf32> to vector<64x1xf32>
      %62 = arith.addf %58, %61 : vector<64x1xf32>
      %c0_30 = arith.constant 0 : index
      %c0_31 = arith.constant 0 : index
      %63 = vector.load %arg10[%c0_30, %c0_31] : memref<64x1xf32, #tpu.memory_space<vmem>>, vector<64x1xf32>
      tpu.vector_store %arg10[%c0_30, %c0_31], %62 {strides = array<i32>} : memref<64x1xf32, #tpu.memory_space<vmem>>, vector<64x1xf32>,
      %c0_32 = arith.constant 0 : index
      %c0_33 = arith.constant 0 : index
      %64 = vector.load %arg11[%c0_32, %c0_33] : memref<64x1xf32, #tpu.memory_space<vmem>>, vector<64x1xf32>
      %cst_34 = arith.constant dense<0.000000e+00> : vector<64xf32>
      %65 = vector.multi_reduction <add>, %41, %cst_34 [1] : vector<64x128xf32> to vector<64xf32>
      %66 = vector.shape_cast %65 : vector<64xf32> to vector<64x1xf32>
      %67 = arith.addf %64, %66 : vector<64x1xf32>
      %c0_35 = arith.constant 0 : index
      %c0_36 = arith.constant 0 : index
      %68 = vector.load %arg11[%c0_35, %c0_36] : memref<64x1xf32, #tpu.memory_space<vmem>>, vector<64x1xf32>
      tpu.vector_store %arg11[%c0_35, %c0_36], %67 {strides = array<i32>} : memref<64x1xf32, #tpu.memory_space<vmem>>, vector<64x1xf32>,
    } else {
    }
    %c1_i32 = arith.constant 1 : i32
    %28 = arith.cmpi eq, %arg1, %c1_i32 : i32
    %29 = arith.extui %28 : i1 to i32
    %c0_i32_14 = arith.constant 0 : i32
    %30 = arith.cmpi ne, %29, %c0_i32_14 : i32
    scf.if %30 {
      %c0_15 = arith.constant 0 : index
      %c0_16 = arith.constant 0 : index
      %31 = vector.load %arg8[%c0_15, %c0_16] : memref<64x1xf32, #tpu.memory_space<vmem>>, vector<64x1xf32>
      %c0_17 = arith.constant 0 : index
      %c0_18 = arith.constant 0 : index
      %32 = vector.load %arg9[%c0_17, %c0_18] : memref<64x1xf32, #tpu.memory_space<vmem>>, vector<64x1xf32>
      %33 = math.log %32 : vector<64x1xf32>
      %34 = arith.addf %31, %33 : vector<64x1xf32>
      %c0_19 = arith.constant 0 : index
      %c0_20 = arith.constant 0 : index
      %35 = vector.load %arg10[%c0_19, %c0_20] : memref<64x1xf32, #tpu.memory_space<vmem>>, vector<64x1xf32>
      %c0_21 = arith.constant 0 : index
      %c0_22 = arith.constant 0 : index
      %36 = vector.load %arg11[%c0_21, %c0_22] : memref<64x1xf32, #tpu.memory_space<vmem>>, vector<64x1xf32>
      %37 = arith.mulf %36, %34 : vector<64x1xf32>
      %38 = arith.subf %35, %37 : vector<64x1xf32>
      %c0_23 = arith.constant 0 : index
      %c0_24 = arith.constant 0 : index
      %39 = vector.load %arg11[%c0_23, %c0_24] : memref<64x1xf32, #tpu.memory_space<vmem>>, vector<64x1xf32>
      %40 = arith.divf %38, %39 : vector<64x1xf32>
      %cst_25 = arith.constant -1.000000e+00 : f32
      %41 = vector.broadcast %cst_25 : f32 to vector<64x1xf32>
      %42 = arith.mulf %41, %40 : vector<64x1xf32>
      %c0_26 = arith.constant 0 : index
      %c0_27 = arith.constant 0 : index
      %43 = vector.load %arg7[%c0_26, %c0_27] : memref<64x1xf32, #tpu.memory_space<vmem>>, vector<64x1xf32>
      tpu.vector_store %arg7[%c0_26, %c0_27], %42 {strides = array<i32>} : memref<64x1xf32, #tpu.memory_space<vmem>>, vector<64x1xf32>,
    } else {
    }
    return
  }
  func.func @transform_0(%arg0: i32, %arg1: i32) -> (i32, i32) {
    %c0_i32 = arith.constant 0 : i32
    %c0_i32_0 = arith.constant 0 : i32
    return %arg0, %c0_i32 : i32, i32
  }
  func.func @transform_1(%arg0: i32, %arg1: i32) -> (i32, i32) {
    %c0_i32 = arith.constant 0 : i32
    %c0_i32_0 = arith.constant 0 : i32
    return %c0_i32, %arg1 : i32, i32
  }
  func.func @transform_2(%arg0: i32, %arg1: i32) -> (i32, i32) {
    %c0_i32 = arith.constant 0 : i32
    %c0_i32_0 = arith.constant 0 : i32
    return %arg0, %c0_i32 : i32, i32
  }
  func.func @transform_3(%arg0: i32, %arg1: i32) -> (i32, i32) {
    %c0_i32 = arith.constant 0 : i32
    %c0_i32_0 = arith.constant 0 : i32
    return %c0_i32, %arg1 : i32, i32
  }
  func.func @transform_4(%arg0: i32, %arg1: i32) -> (i32, i32) {
    %c0_i32 = arith.constant 0 : i32
    %c0_i32_0 = arith.constant 0 : i32
    return %c0_i32, %arg1 : i32, i32
  }
  func.func @transform_5(%arg0: i32, %arg1: i32) -> (i32, i32) {
    %c0_i32 = arith.constant 0 : i32
    %c0_i32_0 = arith.constant 0 : i32
    return %arg0, %c0_i32 : i32, i32
  }
}

</mosaic_0001>

<bundles_post_ra>
// kernel: tpu_custom_call.1
= control target key start
LH: loop header
LB: loop body
LE: loop exit
PB: predicated region body
PF: predicated region fallthrough
CT: control target
= control target key end

     0   :  { %s2764_s0 = inlined_call_operand.hbm [shape: bf16[192,128], index: 0, kind: input, shape index: {}]   ;;  %s2765_s1 = inlined_call_operand.vmem [shape: bf16[128,256], index: 1, kind: input, shape index: {}]   ;;  %s2766_s2 = inlined_call_operand.vmem [shape: s32[192,1], index: 2, kind: input, shape index: {}]   ;;  %s2767_s3 = inlined_call_operand.vmem [shape: s32[1,256], index: 3, kind: input, shape index: {}]   ;;  %s2768_s4 = inlined_call_operand.vmem [shape: f32[1,256], index: 4, kind: input, shape index: {}]   ;;  %s2769_s5 = inlined_call_operand.vmem [shape: f32[192,1], index: 5, kind: output, shape index: {}]  }
   0x1   :  { %2772 = sst [smem:[#allocation14_spill]] %s2764_s0 }
   0x2   :  { %10 = vsyncpa [#allocation7], 0 }
   0x3   :  { %12 = vsyncpa [#allocation7 + $0x1], 0  ;;  %s1974_s18 = smov 0   ;;  %s1976_s19 = smov 0  }
   0x4   :  { %s1978_s20 = smov 0   ;;  %s1980_s21 = smov 0  }
   0x5   :  { %s1982_s22 = smov 0   ;;  %s1984_s23 = smov 0  }
   0x6   :  { %s1986_s24 = smov 0   ;;  %s1988_s25 = smov 0  }
   0x7   :  { %s1990_s26 = smov 0   ;;  %s1992_s27 = smov 0  }
   0x8 LB: > { %s1524_s28 = sadd.s32 4294967295, %s1933_s27   ;;  %s27_s29 = sadd.s32 1, %s1925_s25  ;;  %s1933_s27 = sphi %s1992_s27, %s18_s27   ;;  %s1929_s26 = sphi %s1990_s26, %s2795_s26   ;;  %s1925_s25 = sphi %s1988_s25, %s2794_s25   ;;  %s1921_s24 = sphi %s1986_s24, %s2793_s24   ;;  %s1917_s23 = sphi %s1984_s23, %s2792_s23   ;;  %s1913_s22 = sphi %s1982_s22, %s2791_s22   ;;  %s1909_s21 = sphi %s1980_s21, %s2790_s21   ;;  %s1905_s20 = sphi %s1978_s20, %s2789_s20   ;;  %s1901_s19 = sphi %s1976_s19, %s2788_s19   ;;  %s1897_s18 = sphi %s1974_s18, %s2787_s18  }
   0x9   : > { %p28_p0 = scmp.ge.s32.totalorder %s27_s29, 2  ;;  %s30_s30 = sadd.s32 1, %s1929_s26 }
   0xa   : > { %s37_s6 = sadd.s32 1, %s1913_s22  ;;  %p44_p1 = scmp.ne.s32.totalorder %s1913_s22, %s1909_s21 }
   0xb   : > { %s2797_s29 = smov (%p28_p0, %s27_s29), 0  ;;  %s2799_s30 = smov (!%p28_p0, %s30_s30), %s1929_s26 }
   0xc   : > { %2773 = sst [smem:[#allocation10_spill]] %s2797_s29  ;;  %p45_p2 = scmp.eq.s32.totalorder %s1933_s27, 0 }
   0xd   : > { %p50_p3 = scmp.ne.s32.totalorder %s1909_s21, %s1905_s20  ;;  %p32_p4 = scmp.ge.s32.totalorder %s2799_s30, 3 }
   0xe   : > { %p51_p5 = scmp.eq.s32.totalorder %s1524_s28, 0  ;;  %p2035_p6 = por %p45_p2, %p44_p1 }
   0xf   : > { %s60_s8 = ssub.s32 %s1925_s25, %s2797_s29  ;;  %s2801_s30 = smov (%p32_p4, %s2799_s30), 0 }
  0x10   : > { %2775 = sst [smem:[#allocation11_spill]] %s2801_s30  ;;  %p2043_p7 = por %p51_p5, %p50_p3 }
  0x11   : > { %p61_p8 = scmp.eq.s32.totalorder %s60_s8, 0  ;;  %s34_s10 = ssub.s32 %s1929_s26, %s2801_s30 }
  0x12   : > { %s63_s11 = sadd.s32 1, %s1901_s19  ;;  %p35_p9 = scmp.eq.s32.totalorder %s34_s10, 0 }
  0x13   : > { %p70_p10 = scmp.ne.s32.totalorder %s1901_s19, %s1897_s18  ;;  %p1527_p12 = scmp.ge.s32.totalorder %s1933_s27, 6 }
  0x14   : > { %s2053_s12 = scalar_select %p61_p8, %s1901_s19, %s63_s11  }
  0x15   : > { %s2056_s13 = scalar_select %p35_p9, %s1913_s22, %s37_s6  }
  0x16   : > { %2777 = sst [smem:[#allocation12_spill]] %s2053_s12  ;;  %p2060_p11 = por %p70_p10, %p45_p2 }
  0x17   : > { %2778 = sst [smem:[#allocation13_spill]] %s2056_s13  ;;  %200 = sbr.rel (%p1527_p12) target bundleno = 54 (0x36), region = 16 }
  0x18   : > { %s204_s15 = sand.u32 (!%p1527_p12), 1, %s1913_s22   ;;  %s1568_s16 = sshll.u32 (!%p1527_p12), %s1929_s26, 9 }
  0x19   : > { %s1528_s17 = sshll.u32 (!%p1527_p12), %s204_s15, 5  ;;  %s2780_s0 = sld [smem:[#allocation14_spill]] (!%p1527_p12) }
  0x1a   : > { %s208_s6 = scalar_lea.vmem (!%p1527_p12), [#allocation6], %s1528_s17  ;;  %s205_s11 = scalar_lea.sflag (!%p1527_p12), [#allocation7], %s204_s15 }
  0x1b   : > { %s215_s10 = sshll.u32 (!%p1527_p12), %s208_s6, 4  ;;  %s1935_s29 = smov (!%p1527_p12), [#allocation6]   ;;  %s216_s10 = int_to_ptr.vmem [resolvable:$true] %s215_s10 }
  0x1c   : > { %s1837_s30 = scalar_lea.vmem %s216_s10, 512  ;;  %s1841_s13 = sshll.u32 %s1935_s29, 4  ;;  %s1842_s13 = int_to_ptr.vmem [resolvable:$false] %s1841_s13 }
  0x1d   : > { %p1838_p13 = scmp.ne.s32.totalorder %s216_s10, %s1837_s30  ;;  %s1843_s12 = scalar_lea.vmem %s1842_s13, 1024 }
  0x1e   : > { %p1844_p2 = scmp.lt.s32.totalorder %s216_s10, %s1842_s13  ;;  %p1845_p3 = scmp.lt.s32.totalorder %s1843_s12, %s1837_s30 }
  0x1f   : > { %s214_s8 = scalar_lea.hbm %s2780_s0, %s1568_s16  ;;  %p1839_p0 = pnand %p1838_p13, %p2035_p6 }
  0x20   : > { %p1846_p4 = por %p1845_p3, %p1844_p2 }
  0x21   : > { %p1840_p1 = pneg %p1839_p0 }
  0x23   : > { %p1847_p5 = pnand %p1846_p4, %p1840_p1 }
  0x25   : > { %1850 = shalt.err (!%p1847_p5)
}
  0x26   : > { %s1936_s20 = smov 64   ;;  %s1937_s16 = smov 4  }
  0x27   : > { %1621 = dma.hbm_to_vmem [thread:$0]  (%p2035_p6), %s214_s8, 512, %s216_s10, %s205_s11, %s1936_s20, %s1936_s20, %s1937_s16  }
  0x28   : > { %224 = sbr.rel (!%p2060_p11) target bundleno = 54 (0x36), region = 24  ;;  %s226_s15 = sand.u32 (%p2060_p11), 1, %s1901_s19  }
  0x29   : > { %s1532_s17 = sshll.u32 (%p2060_p11), %s1925_s25, 2  ;;  %s1531_s29 = sshll.u32 (%p2060_p11), %s226_s15, 6 }
  0x2a   : > { %s2081_s30 = scalar_lea.vmem (%p2060_p11), %s2765_s1, %s1532_s17  ;;  %s228_s7 = scalar_lea.vmem (%p2060_p11), [#allocation8], %s1531_s29 }
  0x2b   : > { %v247_v0 = vld [vmem:[%s2081_s30] sm:$0xf] (%p2060_p11)  ;;  %v249_v1 = vld [vmem:[%s2081_s30 + $0x8] sm:$0xf] (%p2060_p11)  ;;  %v251_v2 = vld [vmem:[%s2081_s30 + $0x10] sm:$0xf] (%p2060_p11) }
  0x2c   : > { %248 = vst [vmem:[%s228_s7] sm:$0xf] (%p2060_p11), %v247_v0  ;;  %250 = vst [vmem:[%s228_s7 + $0x4] sm:$0xf] (%p2060_p11), %v249_v1  ;;  %v253_v3 = vld [vmem:[%s2081_s30 + $0x18] sm:$0xf] (%p2060_p11) }
  0x2d   : > { %v255_v4 = vld [vmem:[%s2081_s30 + $0x20] sm:$0xf]  ;;  %252 = vst [vmem:[%s228_s7 + $0x8] sm:$0xf] %v251_v2  ;;  %254 = vst [vmem:[%s228_s7 + $0xc] sm:$0xf] %v253_v3 }
  0x2e   : > { %256 = vst [vmem:[%s228_s7 + $0x10] sm:$0xf] %v255_v4  ;;  %v257_v5 = vld [vmem:[%s2081_s30 + $0x28] sm:$0xf]  ;;  %v259_v6 = vld [vmem:[%s2081_s30 + $0x30] sm:$0xf] }
  0x2f   : > { %v261_v7 = vld [vmem:[%s2081_s30 + $0x38] sm:$0xf]  ;;  %258 = vst [vmem:[%s228_s7 + $0x14] sm:$0xf] %v257_v5  ;;  %260 = vst [vmem:[%s228_s7 + $0x18] sm:$0xf] %v259_v6 }
  0x30   : > { %262 = vst [vmem:[%s228_s7 + $0x1c] sm:$0xf] %v261_v7  ;;  %v263_v8 = vld [vmem:[%s2081_s30 + $0x40] sm:$0xf]  ;;  %v265_v9 = vld [vmem:[%s2081_s30 + $0x48] sm:$0xf] }
  0x31   : > { %v267_v10 = vld [vmem:[%s2081_s30 + $0x50] sm:$0xf]  ;;  %264 = vst [vmem:[%s228_s7 + $0x20] sm:$0xf] %v263_v8  ;;  %266 = vst [vmem:[%s228_s7 + $0x24] sm:$0xf] %v265_v9 }
  0x32   : > { %268 = vst [vmem:[%s228_s7 + $0x28] sm:$0xf] %v267_v10  ;;  %v269_v11 = vld [vmem:[%s2081_s30 + $0x58] sm:$0xf]  ;;  %v271_v12 = vld [vmem:[%s2081_s30 + $0x60] sm:$0xf] }
  0x33   : > { %v273_v13 = vld [vmem:[%s2081_s30 + $0x68] sm:$0xf]  ;;  %270 = vst [vmem:[%s228_s7 + $0x2c] sm:$0xf] %v269_v11  ;;  %272 = vst [vmem:[%s228_s7 + $0x30] sm:$0xf] %v271_v12 }
  0x34   : > { %274 = vst [vmem:[%s228_s7 + $0x34] sm:$0xf] %v273_v13  ;;  %v275_v14 = vld [vmem:[%s2081_s30 + $0x70] sm:$0xf]  ;;  %v277_v15 = vld [vmem:[%s2081_s30 + $0x78] sm:$0xf] }
  0x35   : > { %276 = vst [vmem:[%s228_s7 + $0x38] sm:$0xf] %v275_v14  ;;  %278 = vst [vmem:[%s228_s7 + $0x3c] sm:$0xf] %v277_v15 }
  0x36 PF: > { %p1533_p6 = scmp.ge.s32.totalorder %s1933_s27, 1  ;;  %p354_p8 = scmp.lt.s32.totalorder %s1933_s27, 7 }
  0x38   : > { %p355_p9 = pnand %p1533_p6, %p354_p8 }
  0x39   : > { %s360_s12 = sand.u32 (!%p355_p9), 1, %s1909_s21  }
  0x3a   : > { %358 = sbr.rel (%p355_p9) target bundleno = 1289 (0x509), region = 77  ;;  %s1534_s13 = sshll.u32 (!%p355_p9), %s360_s12, 5 }
  0x3b   : > { %s361_s14 = scalar_lea.sflag (!%p355_p9), [#allocation7], %s360_s12  ;;  %s2102_s8 = scalar_lea.vmem (!%p355_p9), [#allocation6], %s1534_s13 }
  0x3f   : > { %1892 = dma.done.wait (%p2043_p7), %s361_s14, 512  }
  0x40   : > { %1894 = vsyncadd (%p2043_p7), %s361_s14, 4294966784  ;;  %s370_s10 = sand.u32 1, %s1897_s18   ;;  %s1536_s11 = sshll.u32 %s1921_s24, 3 }
  0x41   : > { %s1535_s20 = sshll.u32 %s370_s10, 6  ;;  %p415_p10 = scmp.lt.s32.totalorder %s1536_s11, 23 }
  0x42   : > { %p420_p11 = scmp.lt.s32.totalorder %s1917_s23, 1  ;;  %s2132_s0 = scalar_lea.vmem [#allocation8], %s1535_s20 }
  0x43   : > { %s2803_s11 = smov (!%p415_p10, %s1536_s11), 23  ;;  %p1540_p7 = scmp.ne.s32.totalorder %s1917_s23, 0 }
  0x44   : > { %s2112_s16 = scalar_select %p420_p11, %s1917_s23, 1 }
  0x45   : > { %s1537_s15 = sshll.u32 %s2803_s11, 3  ;;  %436 = sbr.rel (%p1540_p7) target bundleno = 91 (0x5b), region = 89 }
  0x46   : > { %s2117_s9 = scalar_lea.vmem %s2766_s2, %s1537_s15  ;;  %s422_s30 = scalar_lea.vmem %s2767_s3, %s2112_s16 }
  0x47   : > { %s425_s12 = scalar_lea.vmem %s2768_s4, %s2112_s16  ;;  %s2130_s10 = scalar_lea.vmem %s2769_s5, %s1537_s15 }
  0x4a   : > { %vm437_vm0 = vcmask 7168   ;;  %v1938_v16 = vmov -1e+30   ;;  %v1939_v17 = vmov 0.0  }
  0x4b   : > { %438 = vst.msk [vmem:[#allocation2] sm:$0xff] %vm437_vm0, %v1938_v16  ;;  %439 = vst.msk [vmem:[#allocation2 + $0x8] sm:$0xff] %vm437_vm0, %v1938_v16 }
  0x4c   : > { %440 = vst.msk [vmem:[#allocation2 + $0x10] sm:$0xff] %vm437_vm0, %v1938_v16  ;;  %441 = vst.msk [vmem:[#allocation2 + $0x18] sm:$0xff] %vm437_vm0, %v1938_v16 }
  0x4d   : > { %442 = vst.msk [vmem:[#allocation2 + $0x20] sm:$0xff] %vm437_vm0, %v1938_v16  ;;  %443 = vst.msk [vmem:[#allocation2 + $0x28] sm:$0xff] %vm437_vm0, %v1938_v16 }
  0x4e   : > { %444 = vst.msk [vmem:[#allocation2 + $0x30] sm:$0xff] %vm437_vm0, %v1938_v16  ;;  %445 = vst.msk [vmem:[#allocation2 + $0x38] sm:$0xff] %vm437_vm0, %v1938_v16 }
  0x4f   : > { %446 = vst.msk [vmem:[#allocation3] sm:$0xff] %vm437_vm0, %v1939_v17  ;;  %447 = vst.msk [vmem:[#allocation3 + $0x8] sm:$0xff] %vm437_vm0, %v1939_v17 }
  0x50   : > { %448 = vst.msk [vmem:[#allocation3 + $0x10] sm:$0xff] %vm437_vm0, %v1939_v17  ;;  %449 = vst.msk [vmem:[#allocation3 + $0x18] sm:$0xff] %vm437_vm0, %v1939_v17 }
  0x51   : > { %450 = vst.msk [vmem:[#allocation3 + $0x20] sm:$0xff] %vm437_vm0, %v1939_v17  ;;  %451 = vst.msk [vmem:[#allocation3 + $0x28] sm:$0xff] %vm437_vm0, %v1939_v17 }
  0x52   : > { %452 = vst.msk [vmem:[#allocation3 + $0x30] sm:$0xff] %vm437_vm0, %v1939_v17  ;;  %453 = vst.msk [vmem:[#allocation3 + $0x38] sm:$0xff] %vm437_vm0, %v1939_v17 }
  0x53   : > { %454 = vst.msk [vmem:[#allocation4] sm:$0xff] %vm437_vm0, %v1939_v17  ;;  %455 = vst.msk [vmem:[#allocation4 + $0x8] sm:$0xff] %vm437_vm0, %v1939_v17 }
  0x54   : > { %456 = vst.msk [vmem:[#allocation4 + $0x10] sm:$0xff] %vm437_vm0, %v1939_v17  ;;  %457 = vst.msk [vmem:[#allocation4 + $0x18] sm:$0xff] %vm437_vm0, %v1939_v17 }
  0x55   : > { %458 = vst.msk [vmem:[#allocation4 + $0x20] sm:$0xff] %vm437_vm0, %v1939_v17  ;;  %459 = vst.msk [vmem:[#allocation4 + $0x28] sm:$0xff] %vm437_vm0, %v1939_v17 }
  0x56   : > { %460 = vst.msk [vmem:[#allocation4 + $0x30] sm:$0xff] %vm437_vm0, %v1939_v17  ;;  %461 = vst.msk [vmem:[#allocation4 + $0x38] sm:$0xff] %vm437_vm0, %v1939_v17 }
  0x57   : > { %462 = vst.msk [vmem:[#allocation5] sm:$0xff] %vm437_vm0, %v1939_v17  ;;  %463 = vst.msk [vmem:[#allocation5 + $0x8] sm:$0xff] %vm437_vm0, %v1939_v17 }
  0x58   : > { %464 = vst.msk [vmem:[#allocation5 + $0x10] sm:$0xff] %vm437_vm0, %v1939_v17  ;;  %465 = vst.msk [vmem:[#allocation5 + $0x18] sm:$0xff] %vm437_vm0, %v1939_v17 }
  0x59   : > { %466 = vst.msk [vmem:[#allocation5 + $0x20] sm:$0xff] %vm437_vm0, %v1939_v17  ;;  %467 = vst.msk [vmem:[#allocation5 + $0x28] sm:$0xff] %vm437_vm0, %v1939_v17 }
  0x5a   : > { %468 = vst.msk [vmem:[#allocation5 + $0x30] sm:$0xff] %vm437_vm0, %v1939_v17  ;;  %469 = vst.msk [vmem:[#allocation5 + $0x38] sm:$0xff] %vm437_vm0, %v1939_v17 }
  0x5b PF: > { %v1713_v18 = vld [vmem:[%s2132_s0 + $0x38] sm:$0xff]   ;;  %v1714_v19 = vld [vmem:[%s2132_s0 + $0x30] sm:$0xff]   ;;  %v1940_v20 = vmov 0   ;;  %v1715_v21 = vld [vmem:[%s2132_s0 + $0x28] sm:$0xff]   ;;  %s2188_s11 = sshll.u32 %s1921_s24, 6  ;;  %s2191_s20 = sshll.u32 %s1917_s23, 7 }
  0x5c   : > { %1712 = vset.pattern.permute.xlu1 %v1940_v20  ;;  %1711 = vset.pattern.permute.xlu0 %v1940_v20  ;;  %v1716_v22 = vld [vmem:[%s2132_s0 + $0x20] sm:$0xff]   ;;  %v1722_v24 = vld [vmem:[%s2102_s8 + $0x10] sm:$0xff]   ;;  %v1717_v25 = vld [vmem:[%s2132_s0 + $0x18] sm:$0xff]   ;;  %s703_s15 = sadd.s32 64, %s2188_s11  ;;  %v1941_v42 = vmov 0.0  }
  0x5d   : > { %1581 = vmatprep.subr.bf16.mxu0 %v1713_v18  ;;  %1605 = vmatprep.subr.bf16.mxu1 %v1713_v18  ;;  %v1721_v23 = vld [vmem:[%s2102_s8] sm:$0xff]   ;;  %v640_v26 = vld [vmem:[%s2117_s9 + $0x10] sm:$0xff]  ;;  %v641_v28 = vld [vmem:[%s2117_s9 + $0x18] sm:$0xff]  ;;  %p2201_p13 = scmp.lt.s32.totalorder %s2191_s20, %s703_s15 }
  0x5e   : > { %1582 = vmatpush3.bf16.msra.mxu0 %v1713_v18  ;;  %1613 = vmatpush3.bf16.msra.mxu1 %v1713_v18  ;;  %v638_v27 = vld [vmem:[%s2117_s9] sm:$0xff]  ;;  %v639_v29 = vld [vmem:[%s2117_s9 + $0x8] sm:$0xff]  ;;  %v1718_v30 = vld [vmem:[%s2132_s0 + $0x10] sm:$0xff]  }
  0x5f   : > { %1583 = vmatprep.subr.bf16.mxu0 %v1714_v19  ;;  %1606 = vmatprep.subr.bf16.mxu1 %v1714_v19  ;;  %v643_v31 = vld [vmem:[%s2117_s9 + $0x28] sm:$0xff]  ;;  %v642_v32 = vld [vmem:[%s2117_s9 + $0x20] sm:$0xff]  ;;  %v645_v34 = vld [vmem:[%s2117_s9 + $0x38] sm:$0xff] }
  0x60   : > { %1597 = vmatprep.mubr.bf16.mxu0 %v1721_v23  ;;  %1601 = vmatprep.mubr.bf16.mxu1 %v1722_v24  ;;  %v1719_v33 = vld [vmem:[%s2132_s0 + $0x8] sm:$0xff]   ;;  %v644_v35 = vld [vmem:[%s2117_s9 + $0x30] sm:$0xff]  ;;  %v1720_v36 = vld [vmem:[%s2132_s0] sm:$0xff]   ;;  %s701_s0 = sadd.s32 128, %s2191_s20 }
  0x61   : > { %654 = vperm.xlu1 %1712, %v640_v26   ;;  %648 = vperm.xlu0 %1711, %v638_v27   ;;  %v1723_v37 = vld [vmem:[%s2102_s8 + $0x8] sm:$0xff]   ;;  %v1724_v38 = vld [vmem:[%s2102_s8 + $0x18] sm:$0xff]   ;;  %p2196_p12 = scmp.lt.s32.totalorder %s2188_s11, %s701_s0  ;;  %v1554_v39 = vld [vmem:[%s422_s30] ss:$0 sm:$0xff] }
  0x62   : > { %1584 = vmatpush3.bf16.msra.mxu0 %v1714_v19  ;;  %1614 = vmatpush3.bf16.msra.mxu1 %v1714_v19  ;;  %v1541_v57 = vld [vmem:[%s425_s12] ss:$0 sm:$0xff] }
  0x63   : > { %1585 = vmatprep.subr.bf16.mxu0 %v1715_v21  ;;  %1607 = vmatprep.subr.bf16.mxu1 %v1715_v21  ;;  %p705_p0 = pnand %p2201_p13, %p2196_p12 }
  0x65   : > { %657 = vperm.xlu1 %1712, %v641_v28   ;;  %651 = vperm.xlu0 %1711, %v639_v29  }
  0x66   : > { %1586 = vmatpush3.bf16.msra.mxu0 %v1715_v21  ;;  %1615 = vmatpush3.bf16.msra.mxu1 %v1715_v21 }
  0x67   : > { %1587 = vmatprep.subr.bf16.mxu0 %v1716_v22  ;;  %1608 = vmatprep.subr.bf16.mxu1 %v1716_v22 }
  0x69   : > { %663 = vperm.xlu1 %1712, %v643_v31   ;;  %660 = vperm.xlu0 %1711, %v642_v32  }
  0x6a   : > { %1588 = vmatpush3.bf16.msra.mxu0 %v1716_v22  ;;  %1616 = vmatpush3.bf16.msra.mxu1 %v1716_v22 }
  0x6b   : > { %1589 = vmatprep.subr.bf16.mxu0 %v1717_v25  ;;  %1609 = vmatprep.subr.bf16.mxu1 %v1717_v25 }
  0x6d   : > { %669 = vperm.xlu1 %1712, %v645_v34   ;;  %666 = vperm.xlu0 %1711, %v644_v35  }
  0x6e   : > { %1590 = vmatpush3.bf16.msra.mxu0 %v1717_v25  ;;  %1617 = vmatpush3.bf16.msra.mxu1 %v1717_v25 }
  0x6f   : > { %1591 = vmatprep.subr.bf16.mxu0 %v1718_v30  ;;  %1610 = vmatprep.subr.bf16.mxu1 %v1718_v30 }
  0x72   : > { %1592 = vmatpush3.bf16.msra.mxu0 %v1718_v30  ;;  %1618 = vmatpush3.bf16.msra.mxu1 %v1718_v30 }
  0x73   : > { %1593 = vmatprep.subr.bf16.mxu0 %v1719_v33  ;;  %1611 = vmatprep.subr.bf16.mxu1 %v1719_v33 }
  0x76   : > { %1594 = vmatpush3.bf16.msra.mxu0 %v1719_v33  ;;  %1619 = vmatpush3.bf16.msra.mxu1 %v1719_v33 }
  0x77   : > { %1595 = vmatprep.subr.bf16.mxu0 %v1720_v36  ;;  %1612 = vmatprep.subr.bf16.mxu1 %v1720_v36 }
  0x7a   : > { %1596 = vmatpush3.bf16.msra.mxu0 %v1720_v36  ;;  %1620 = vmatpush3.bf16.msra.mxu1 %v1720_v36 }
  0x7d   : > { %1598 = vmatmul.mubr.bf16.vlgmr.msra.gmra.mxu0 %v1723_v37  ;;  %1602 = vmatmul.mubr.bf16.vlgmr.msra.gmra.mxu1 %v1724_v38 }
  0xdc   : > { %v655_v40 = vpop.permute.xlu1 %654  ;;  %v649_v41 = vpop.permute.xlu0 %648 }
  0xdd   : > { %vm677_vm1 = vcmp.eq.s32.totalorder %v655_v40, %v1554_v39  ;;  %vm675_vm2 = vcmp.eq.s32.totalorder %v649_v41, %v1554_v39 }
  0xde   : > { %v2214_v43 = vsel %vm677_vm1, 1.0, %v1941_v42  ;;  %v2216_v44 = vsel %vm675_vm2, 1.0, %v1941_v42 }
  0xe0   : > { %v658_v45 = vpop.permute.xlu1 %657  ;;  %v652_v46 = vpop.permute.xlu0 %651 }
  0xe1   : > { %vm678_vm3 = vcmp.eq.s32.totalorder %v658_v45, %v1554_v39  ;;  %vm676_vm4 = vcmp.eq.s32.totalorder %v652_v46, %v1554_v39 }
  0xe2   : > { %v2218_v47 = vsel %vm678_vm3, 1.0, %v1941_v42  ;;  %v2220_v48 = vsel %vm676_vm4, 1.0, %v1941_v42 }
  0xe4   : > { %v664_v49 = vpop.permute.xlu1 %663  ;;  %v661_v50 = vpop.permute.xlu0 %660 }
  0xe5   : > { %vm680_vm5 = vcmp.eq.s32.totalorder %v664_v49, %v1554_v39  ;;  %vm679_vm6 = vcmp.eq.s32.totalorder %v661_v50, %v1554_v39 }
  0xe6   : > { %v2222_v51 = vsel %vm680_vm5, 1.0, %v1941_v42  ;;  %v2224_v52 = vsel %vm679_vm6, 1.0, %v1941_v42 }
  0xe8   : > { %v670_v53 = vpop.permute.xlu1 %669  ;;  %v667_v54 = vpop.permute.xlu0 %666 }
  0xe9   : > { %vm682_vm7 = vcmp.eq.s32.totalorder %v670_v53, %v1554_v39  ;;  %vm681_vm8 = vcmp.eq.s32.totalorder %v667_v54, %v1554_v39 }
  0xea   : > { %v2226_v55 = vsel %vm682_vm7, 1.0, %v1941_v42  ;;  %v2228_v56 = vsel %vm681_vm8, 1.0, %v1941_v42 }
 0x13d   : > { %v1599_v58 = vpop.f32.mrf.mxu0  ;;  %v1603_v59 = vpop.f32.mrf.mxu1 }
 0x13e   : > { %v2235_v60 = vadd.f32 %v1599_v58, %v1541_v57  ;;  %v2237_v61 = vadd.f32 %v1603_v59, %v1541_v57 }
 0x13f   : > { %v607_v62 = vpop.f32.mrf.mxu0  ;;  %v623_v63 = vpop.f32.mrf.mxu1 }
 0x140   : > { %v2239_v0 = vadd.f32 %v1541_v57, %v607_v62  ;;  %v2241_v1 = vadd.f32 %v1541_v57, %v623_v63  ;;  %708 = sbr.rel (%p705_p0) target bundleno = 788 (0x314), region = 93 }
 0x141   : > { %v1600_v2 = vpop.f32.mrf.mxu0  ;;  %v1604_v3 = vpop.f32.mrf.mxu1 }
 0x142   : > { %v2243_v4 = vadd.f32 %v1600_v2, %v1541_v57  ;;  %v2245_v5 = vadd.f32 %v1604_v3, %v1541_v57 }
 0x143   : > { %v610_v6 = vpop.f32.mrf.mxu0  ;;  %v626_v7 = vpop.f32.mrf.mxu1 }
 0x144   : > { %v2247_v8 = vadd.f32 %v1541_v57, %v610_v6  ;;  %v2249_v9 = vadd.f32 %v1541_v57, %v626_v7 }
 0x145   : > { %v709_v10 = vlaneseq  ;;  %v718_v11 = vstv %s2188_s11  ;;  %v729_v12 = vstv %s2191_s20  ;;  %v1942_v39 = vmov 0   ;;  %v2348_v40 = vld [vmem:[#allocation2] sm:$0xff]  ;;  %v2350_v42 = vld [vmem:[#allocation2 + $0x10] sm:$0xff]  ;;  %v2355_v46 = vld [vmem:[#allocation2 + $0x8] sm:$0xff] }
 0x146   : > { %1725 = vset.pattern.permute.xlu0 %v1942_v39  ;;  %1726 = vset.pattern.permute.xlu1 %v1942_v39  ;;  %vm915_vm1 = vcmask 7168   ;;  %v2365_v57 = vld [vmem:[#allocation2 + $0x18] sm:$0xff]  ;;  %v2374_v63 = vld [vmem:[#allocation2 + $0x20] sm:$0xff]  ;;  %v2384_v7 = vld [vmem:[#allocation2 + $0x28] sm:$0xff] }
 0x147   : > { %v710_v13 = vshrl.u32 %v709_v10, 7  ;;  %v728_v14 = vand.u32 127, %v709_v10 }
 0x149   : > { %v2258_v15 = vadd.s32 %v718_v11, %v710_v13  ;;  %v2260_v16 = vadd.s32 %v729_v12, %v728_v14  ;;  %v711_v17 = vadd.s32 8, %v710_v13  ;;  %v712_v18 = vadd.s32 16, %v710_v13 }
 0x14a   : > { %v713_v19 = vadd.s32 24, %v710_v13  ;;  %v714_v20 = vadd.s32 32, %v710_v13  ;;  %v715_v21 = vadd.s32 40, %v710_v13  ;;  %v716_v24 = vadd.s32 48, %v710_v13 }
 0x14b   : > { %vm731_vm9 = vcmp.ne.s32.totalorder %v2258_v15, %v2260_v16  ;;  %v2264_v22 = vadd.s32 %v718_v11, %v711_v17  ;;  %v2266_v23 = vadd.s32 %v718_v11, %v712_v18  ;;  %v717_v29 = vadd.s32 56, %v710_v13  ;;  %v2393_v13 = vld [vmem:[#allocation2 + $0x30] sm:$0xff] }
 0x14c   : > { %v2272_v25 = vsel %vm731_vm9, %v2239_v0, -1e+30  ;;  %v2274_v26 = vadd.s32 %v718_v11, %v713_v19  ;;  %v2276_v27 = vadd.s32 %v718_v11, %v714_v20  ;;  %v2283_v28 = vadd.s32 %v718_v11, %v715_v21  ;;  %v2403_v19 = vld [vmem:[#allocation2 + $0x38] sm:$0xff] }
 0x14d   : > { %763 = vmax.xlane.f32.xlu0 %v2272_v25  ;;  %vm732_vm10 = vcmp.ne.s32.totalorder %v2264_v22, %v2260_v16  ;;  %vm733_vm11 = vcmp.ne.s32.totalorder %v2266_v23, %v2260_v16  ;;  %v2302_v32 = vadd.s32 %v718_v11, %v716_v24  ;;  %v2313_v34 = vadd.s32 %v718_v11, %v717_v29 }
 0x14e   : > { %v2289_v30 = vsel %vm732_vm10, %v2247_v8, -1e+30  ;;  %v2295_v31 = vsel %vm733_vm11, %v2235_v60, -1e+30  ;;  %vm734_vm12 = vcmp.ne.s32.totalorder %v2274_v26, %v2260_v16  ;;  %vm735_vm13 = vcmp.ne.s32.totalorder %v2276_v27, %v2260_v16 }
 0x14f   : > { %767 = vmax.xlane.f32.xlu1 %v2295_v31  ;;  %v2308_v33 = vsel %vm734_vm12, %v2243_v4, -1e+30  ;;  %vm736_vm14 = vcmp.ne.s32.totalorder %v2283_v28, %v2260_v16  ;;  %v2319_v35 = vsel %vm735_vm13, %v2241_v1, -1e+30  ;;  %vm737_vm15 = vcmp.ne.s32.totalorder %v2302_v32, %v2260_v16 }
 0x150   : > { %v2328_v36 = vsel %vm736_vm14, %v2249_v9, -1e+30  ;;  %vm738_vm0 = vcmp.ne.s32.totalorder %v2313_v34, %v2260_v16  ;;  %v2337_v37 = vsel %vm737_vm15, %v2237_v61, -1e+30  ;;  %v748_v27 = vsel %vm732_vm10, %v2220_v48, 0.0 }
 0x151   : > { %765 = vmax.xlane.f32.xlu0 %v2289_v30  ;;  %v2344_v38 = vsel %vm738_vm0, %v2245_v5, -1e+30  ;;  %v750_v32 = vsel %vm734_vm12, %v2218_v47, 0.0  ;;  %v2470_v22 = vsel %vm738_vm0, %v2226_v55, 0.0 }
 0x152   : > { %v947_v26 = vmul.f32 %v2470_v22, %v2344_v38 }
 0x153   : > { %769 = vmax.xlane.f32.xlu1 %v2308_v33 }
 0x155   : > { %771 = vmax.xlane.f32.xlu0 %v2319_v35 }
 0x157   : > { %773 = vmax.xlane.f32.xlu1 %v2328_v36 }
 0x159   : > { %775 = vmax.xlane.f32.xlu0 %v2337_v37 }
 0x15b   : > { %777 = vmax.xlane.f32.xlu1 %v2344_v38 }
 0x1d6   : > { %v764_v41 = vpop.xlane.xlu0 %763 }
 0x1d7   : > { %v2353_v45 = vmax.f32 %v2348_v40, %v764_v41 }
 0x1d8   : > { %v768_v49 = vpop.xlane.xlu1 %767 }
 0x1d9   : > { %v787_v50 = vsub.f32 %v2348_v40, %v2353_v45  ;;  %924 = vst.msk [vmem:[#allocation2] sm:$0xff] %vm915_vm1, %v2353_v45  ;;  %829 = vperm.xlu0 %1725, %v2353_v45   ;;  %v2363_v53 = vmax.f32 %v2350_v42, %v768_v49  ;;  %v747_v49 = vsel %vm731_vm9, %v2216_v44, 0.0 }
 0x1da   : > { %v766_v54 = vpop.xlane.xlu0 %765 }
 0x1db   : > { %v2368_v58 = vmax.f32 %v2355_v46, %v766_v54  ;;  %v789_v59 = vsub.f32 %v2350_v42, %v2363_v53  ;;  %926 = vst.msk [vmem:[#allocation2 + $0x10] sm:$0xff] %vm915_vm1, %v2363_v53  ;;  %v940_v54 = vmul.f32 %v747_v49, %v2272_v25 }
 0x1dc   : > { %v770_v62 = vpop.xlane.xlu1 %769 }
 0x1dd   : > { %v788_v2 = vsub.f32 %v2355_v46, %v2368_v58  ;;  %925 = vst.msk [vmem:[#allocation2 + $0x8] sm:$0xff] %vm915_vm1, %v2368_v58  ;;  %834 = vperm.xlu1 %1726, %v2368_v58   ;;  %v2382_v3 = vmax.f32 %v2365_v57, %v770_v62  ;;  %v749_v62 = vsel %vm733_vm11, %v2214_v43, 0.0 }
 0x1de   : > { %v772_v6 = vpop.xlane.xlu0 %771 }
 0x1df   : > { %v790_v10 = vsub.f32 %v2365_v57, %v2382_v3  ;;  %927 = vst.msk [vmem:[#allocation2 + $0x18] sm:$0xff] %vm915_vm1, %v2382_v3  ;;  %v2391_v11 = vmax.f32 %v2374_v63, %v772_v6  ;;  %v942_v6 = vmul.f32 %v749_v62, %v2295_v31 }
 0x1e0   : > { %v774_v12 = vpop.xlane.xlu1 %773 }
 0x1e1   : > { %839 = vperm.xlu1 %1726, %v2363_v53   ;;  %v791_v14 = vsub.f32 %v2374_v63, %v2391_v11  ;;  %928 = vst.msk [vmem:[#allocation2 + $0x20] sm:$0xff] %vm915_vm1, %v2391_v11  ;;  %v2401_v17 = vmax.f32 %v2384_v7, %v774_v12  ;;  %v751_v12 = vsel %vm735_vm13, %v2224_v52, 0.0 }
 0x1e2   : > { %v776_v18 = vpop.xlane.xlu0 %775  ;;  %v944_v15 = vmul.f32 %v751_v12, %v2319_v35 }
 0x1e3   : > { %v792_v20 = vsub.f32 %v2384_v7, %v2401_v17  ;;  %929 = vst.msk [vmem:[#allocation2 + $0x28] sm:$0xff] %vm915_vm1, %v2401_v17  ;;  %v2410_v21 = vmax.f32 %v2393_v13, %v776_v18  ;;  %v2447_v18 = vsel %vm737_vm15, %v2228_v56, 0.0  ;;  %v803_v40 = vmul.f32 1.442695, %v791_v14 }
 0x1e4   : > { %v778_v24 = vpop.xlane.xlu1 %777  ;;  %v946_v23 = vmul.f32 %v2447_v18, %v2337_v37 }
 0x1e5   : > { %844 = vperm.xlu1 %1726, %v2382_v3   ;;  %v793_v29 = vsub.f32 %v2393_v13, %v2410_v21  ;;  %930 = vst.msk [vmem:[#allocation2 + $0x30] sm:$0xff] %vm915_vm1, %v2410_v21  ;;  %v2418_v39 = vmax.f32 %v2403_v19, %v778_v24  ;;  %v941_v24 = vmul.f32 %v748_v27, %v2289_v30  ;;  %v805_v46 = vmul.f32 1.442695, %v792_v20 }
 0x1e7   : > { %v794_v41 = vsub.f32 %v2403_v19, %v2418_v39  ;;  %931 = vst.msk [vmem:[#allocation2 + $0x38] sm:$0xff] %vm915_vm1, %v2418_v39  ;;  %v807_v57 = vmul.f32 1.442695, %v793_v29 }
 0x1e9   : > { %849 = vperm.xlu1 %1726, %v2391_v11   ;;  %v813_v11 = vld [vmem:[#allocation3 + $0x10] sm:$0xff]  ;;  %v809_v7 = vmul.f32 1.442695, %v794_v41  ;;  %v816_v41 = vld [vmem:[#allocation3 + $0x28] sm:$0xff] }
 0x1ed   : > { %854 = vperm.xlu1 %1726, %v2401_v17  }
 0x1f1   : > { %859 = vperm.xlu1 %1726, %v2410_v21  }
 0x1f5   : > { %864 = vperm.xlu1 %1726, %v2418_v39  }
 0x1f8   : > { %948 = vadd.xlane.f32.xlu0 %v940_v54  ;;  %v943_v54 = vmul.f32 %v750_v32, %v2308_v33 }
 0x1fc   : > { %952 = vadd.xlane.f32.xlu0 %v942_v6 }
 0x200   : > { %956 = vadd.xlane.f32.xlu0 %v944_v15 }
 0x204   : > { %960 = vadd.xlane.f32.xlu0 %v946_v23 }
 0x208   : > { %988 = vadd.xlane.f32.xlu0 %v747_v49  ;;  %v752_v49 = vsel %vm736_vm14, %v2222_v51, 0.0 }
 0x20c   : > { %992 = vadd.xlane.f32.xlu0 %v749_v62  ;;  %v945_v62 = vmul.f32 %v752_v49, %v2328_v36 }
 0x210   : > { %996 = vadd.xlane.f32.xlu0 %v751_v12 }
 0x219   : > { %950 = vadd.xlane.f32.xlu1 %v941_v24 }
 0x21d   : > { %954 = vadd.xlane.f32.xlu1 %v943_v54 }
 0x221   : > { %958 = vadd.xlane.f32.xlu1 %v945_v62 }
 0x225   : > { %962 = vadd.xlane.f32.xlu1 %v947_v26 }
 0x229   : > { %990 = vadd.xlane.f32.xlu1 %v748_v27 }
 0x22d   : > { %994 = vadd.xlane.f32.xlu1 %v750_v32 }
 0x231   : > { %998 = vadd.xlane.f32.xlu1 %v752_v49 }
 0x254   : > { %v830_v6 = vpop.permute.xlu0 %829 }
 0x255   : > { %v867_v28 = vsub.f32 %v2272_v25, %v830_v6 }
 0x257   : > { %v875_v12 = vmul.f32 1.442695, %v867_v28 }
 0x258   : > { %v835_v15 = vpop.permute.xlu1 %834 }
 0x259   : > { %1727 = vpow2.f32 %v875_v12  ;;  %v868_v23 = vsub.f32 %v2289_v30, %v835_v15 }
 0x25b   : > { %v877_v24 = vmul.f32 1.442695, %v868_v23 }
 0x25c   : > { %v840_v16 = vpop.permute.xlu1 %839 }
 0x25d   : > { %1729 = vpow2.f32 %v877_v24  ;;  %v869_v34 = vsub.f32 %v2295_v31, %v840_v16 }
 0x25f   : > { %v879_v54 = vmul.f32 1.442695, %v869_v34 }
 0x260   : > { %v845_v62 = vpop.permute.xlu1 %844 }
 0x261   : > { %1731 = vpow2.f32 %v879_v54  ;;  %v870_v27 = vsub.f32 %v2308_v33, %v845_v62 }
 0x263   : > { %v881_v32 = vmul.f32 1.442695, %v870_v27 }
 0x264   : > { %v850_v49 = vpop.permute.xlu1 %849 }
 0x265   : > { %1733 = vpow2.f32 %v881_v32  ;;  %v871_v25 = vsub.f32 %v2319_v35, %v850_v49  ;;  %v932_v32 = vld [vmem:[#allocation4] sm:$0xff] }
 0x266   : > { %v1728_v26 = vpop.eup %1727 }
 0x267   : > { %v883_v6 = vmul.f32 1.442695, %v871_v25  ;;  %891 = vadd.xlane.f32.xlu1 %v1728_v26  ;;  %v934_v26 = vld [vmem:[#allocation4 + $0x10] sm:$0xff] }
 0x268   : > { %v855_v28 = vpop.permute.xlu1 %854 }
 0x269   : > { %1735 = vpow2.f32 %v883_v6  ;;  %v872_v30 = vsub.f32 %v2328_v36, %v855_v28  ;;  %v936_v28 = vld [vmem:[#allocation4 + $0x20] sm:$0xff] }
 0x26a   : > { %v1730_v12 = vpop.eup %1729 }
 0x26b   : > { %v885_v15 = vmul.f32 1.442695, %v872_v30  ;;  %893 = vadd.xlane.f32.xlu0 %v1730_v12 }
 0x26c   : > { %v860_v31 = vpop.permute.xlu1 %859 }
 0x26d   : > { %1737 = vpow2.f32 %v885_v15  ;;  %v873_v23 = vsub.f32 %v2337_v37, %v860_v31  ;;  %v938_v15 = vld [vmem:[#allocation4 + $0x30] sm:$0xff] }
 0x26e   : > { %v1732_v33 = vpop.eup %1731 }
 0x26f   : > { %v887_v24 = vmul.f32 1.442695, %v873_v23  ;;  %895 = vadd.xlane.f32.xlu0 %v1732_v33  ;;  %v980_v33 = vld [vmem:[#allocation5] sm:$0xff] }
 0x270   : > { %v865_v16 = vpop.permute.xlu1 %864 }
 0x271   : > { %1739 = vpow2.f32 %v887_v24  ;;  %v874_v35 = vsub.f32 %v2344_v38, %v865_v16  ;;  %v982_v16 = vld [vmem:[#allocation5 + $0x10] sm:$0xff] }
 0x272   : > { %v1734_v34 = vpop.eup %1733 }
 0x273   : > { %v889_v54 = vmul.f32 1.442695, %v874_v35  ;;  %897 = vadd.xlane.f32.xlu1 %v1734_v34  ;;  %v984_v34 = vld [vmem:[#allocation5 + $0x20] sm:$0xff] }
 0x275   : > { %1741 = vpow2.f32 %v889_v54 }
 0x276   : > { %v1736_v62 = vpop.eup %1735 }
 0x277   : > { %899 = vadd.xlane.f32.xlu0 %v1736_v62 }
 0x27a   : > { %v1738_v36 = vpop.eup %1737 }
 0x27b   : > { %901 = vadd.xlane.f32.xlu1 %v1738_v36  ;;  %v933_v36 = vld [vmem:[#allocation4 + $0x8] sm:$0xff] }
 0x27e   : > { %v1740_v27 = vpop.eup %1739 }
 0x27f   : > { %903 = vadd.xlane.f32.xlu0 %v1740_v27 }
 0x281   : > { %v949_v49 = vpop.xlane.xlu0 %948 }
 0x282   : > { %v1742_v37 = vpop.eup %1741  ;;  %v964_v25 = vadd.f32 %v949_v49, %v932_v32  ;;  %v935_v49 = vld [vmem:[#allocation4 + $0x18] sm:$0xff] }
 0x283   : > { %905 = vadd.xlane.f32.xlu1 %v1742_v37  ;;  %1000 = vadd.xlane.f32.xlu0 %v2447_v18 }
 0x284   : > { %972 = vst.msk [vmem:[#allocation4] sm:$0xff] %vm915_vm1, %v964_v25 }
 0x285   : > { %v953_v38 = vpop.xlane.xlu0 %952 }
 0x286   : > { %v966_v6 = vadd.f32 %v953_v38, %v934_v26  ;;  %v937_v26 = vld [vmem:[#allocation4 + $0x28] sm:$0xff] }
 0x287   : > { %1002 = vadd.xlane.f32.xlu1 %v2470_v22 }
 0x288   : > { %974 = vst.msk [vmem:[#allocation4 + $0x10] sm:$0xff] %vm915_vm1, %v966_v6 }
 0x289   : > { %v957_v30 = vpop.xlane.xlu0 %956 }
 0x28a   : > { %v968_v12 = vadd.f32 %v957_v30, %v936_v28  ;;  %v939_v28 = vld [vmem:[#allocation4 + $0x38] sm:$0xff] }
 0x28c   : > { %976 = vst.msk [vmem:[#allocation4 + $0x20] sm:$0xff] %vm915_vm1, %v968_v12 }
 0x28d   : > { %v961_v31 = vpop.xlane.xlu0 %960 }
 0x28e   : > { %v970_v23 = vadd.f32 %v961_v31, %v938_v15  ;;  %v981_v15 = vld [vmem:[#allocation5 + $0x8] sm:$0xff] }
 0x290   : > { %978 = vst.msk [vmem:[#allocation4 + $0x30] sm:$0xff] %vm915_vm1, %v970_v23 }
 0x291   : > { %v989_v18 = vpop.xlane.xlu0 %988 }
 0x292   : > { %v1004_v24 = vadd.f32 %v989_v18, %v980_v33  ;;  %v983_v33 = vld [vmem:[#allocation5 + $0x18] sm:$0xff] }
 0x294   : > { %1012 = vst.msk [vmem:[#allocation5] sm:$0xff] %vm915_vm1, %v1004_v24 }
 0x295   : > { %v993_v35 = vpop.xlane.xlu0 %992 }
 0x296   : > { %v1006_v22 = vadd.f32 %v993_v35, %v982_v16  ;;  %v985_v16 = vld [vmem:[#allocation5 + $0x28] sm:$0xff] }
 0x298   : > { %1014 = vst.msk [vmem:[#allocation5 + $0x10] sm:$0xff] %vm915_vm1, %v1006_v22 }
 0x299   : > { %v997_v54 = vpop.xlane.xlu0 %996 }
 0x29a   : > { %v1008_v62 = vadd.f32 %v997_v54, %v984_v34  ;;  %v795_v34 = vmul.f32 1.442695, %v787_v50  ;;  %v797_v54 = vmul.f32 1.442695, %v788_v2  ;;  %v811_v50 = vld [vmem:[#allocation3] sm:$0xff] }
 0x29c   : > { %1016 = vst.msk [vmem:[#allocation5 + $0x20] sm:$0xff] %vm915_vm1, %v1008_v62  ;;  %1743 = vpow2.f32 %v795_v34  ;;  %v799_v62 = vmul.f32 1.442695, %v789_v59  ;;  %v812_v59 = vld [vmem:[#allocation3 + $0x8] sm:$0xff] }
 0x29d   : > { %1745 = vpow2.f32 %v797_v54 }
 0x29e   : > { %1747 = vpow2.f32 %v799_v62 }
 0x2a2   : > { %v951_v27 = vpop.xlane.xlu1 %950 }
 0x2a3   : > { %v965_v32 = vadd.f32 %v951_v27, %v933_v36  ;;  %v801_v36 = vmul.f32 1.442695, %v790_v10 }
 0x2a5   : > { %973 = vst.msk [vmem:[#allocation4 + $0x8] sm:$0xff] %vm915_vm1, %v965_v32  ;;  %1749 = vpow2.f32 %v801_v36  ;;  %v814_v32 = vld [vmem:[#allocation3 + $0x18] sm:$0xff] }
 0x2a6   : > { %v955_v37 = vpop.xlane.xlu1 %954  ;;  %1751 = vpow2.f32 %v803_v40  ;;  %v987_v36 = vld [vmem:[#allocation5 + $0x38] sm:$0xff] }
 0x2a7   : > { %v967_v25 = vadd.f32 %v955_v37, %v935_v49  ;;  %1753 = vpow2.f32 %v805_v46  ;;  %v815_v37 = vld [vmem:[#allocation3 + $0x20] sm:$0xff] }
 0x2a8   : > { %1755 = vpow2.f32 %v807_v57 }
 0x2a9   : > { %975 = vst.msk [vmem:[#allocation4 + $0x18] sm:$0xff] %vm915_vm1, %v967_v25  ;;  %v1744_v45 = vpop.eup %1743  ;;  %1757 = vpow2.f32 %v809_v7 }
 0x2aa   : > { %v959_v38 = vpop.xlane.xlu1 %958  ;;  %v819_v58 = vmul.f32 %v1744_v45, %v811_v50  ;;  %v1746_v42 = vpop.eup %1745 }
 0x2ab   : > { %v969_v6 = vadd.f32 %v959_v38, %v937_v26  ;;  %v820_v63 = vmul.f32 %v1746_v42, %v812_v59  ;;  %v1748_v3 = vpop.eup %1747 }
 0x2ac   : > { %v821_v17 = vmul.f32 %v1748_v3, %v813_v11 }
 0x2ad   : > { %977 = vst.msk [vmem:[#allocation4 + $0x28] sm:$0xff] %vm915_vm1, %v969_v6 }
 0x2ae   : > { %v963_v30 = vpop.xlane.xlu1 %962 }
 0x2af   : > { %v971_v12 = vadd.f32 %v963_v30, %v939_v28 }
 0x2b1   : > { %979 = vst.msk [vmem:[#allocation4 + $0x38] sm:$0xff] %vm915_vm1, %v971_v12  ;;  %v817_v12 = vld [vmem:[#allocation3 + $0x30] sm:$0xff] }
 0x2b2   : > { %v991_v31 = vpop.xlane.xlu1 %990  ;;  %v1750_v20 = vpop.eup %1749 }
 0x2b3   : > { %v1005_v23 = vadd.f32 %v991_v31, %v981_v15  ;;  %v822_v21 = vmul.f32 %v1750_v20, %v814_v32  ;;  %v1752_v29 = vpop.eup %1751 }
 0x2b4   : > { %v823_v26 = vmul.f32 %v1752_v29, %v815_v37  ;;  %v1754_v19 = vpop.eup %1753 }
 0x2b5   : > { %1013 = vst.msk [vmem:[#allocation5 + $0x8] sm:$0xff] %vm915_vm1, %v1005_v23  ;;  %v824_v6 = vmul.f32 %v1754_v19, %v816_v41  ;;  %v1756_v28 = vpop.eup %1755 }
 0x2b6   : > { %v995_v18 = vpop.xlane.xlu1 %994  ;;  %v825_v31 = vmul.f32 %v1756_v28, %v817_v12  ;;  %v1758_v23 = vpop.eup %1757 }
 0x2b7   : > { %v1007_v24 = vadd.f32 %v995_v18, %v983_v33  ;;  %v818_v18 = vld [vmem:[#allocation3 + $0x38] sm:$0xff] }
 0x2b9   : > { %1015 = vst.msk [vmem:[#allocation5 + $0x18] sm:$0xff] %vm915_vm1, %v1007_v24 }
 0x2ba   : > { %v999_v35 = vpop.xlane.xlu1 %998 }
 0x2bb   : > { %v1009_v22 = vadd.f32 %v999_v35, %v985_v16  ;;  %v986_v16 = vld [vmem:[#allocation5 + $0x30] sm:$0xff]  ;;  %v826_v35 = vmul.f32 %v1758_v23, %v818_v18 }
 0x2bd   : > { %1017 = vst.msk [vmem:[#allocation5 + $0x28] sm:$0xff] %vm915_vm1, %v1009_v22 }
 0x2f0   : > { %v892_v53 = vpop.xlane.xlu1 %891 }
 0x2f1   : > { %v907_v2 = vadd.f32 %v892_v53, %v819_v58 }
 0x2f3   : > { %916 = vst.msk [vmem:[#allocation3] sm:$0xff] %vm915_vm1, %v907_v2 }
 0x2f4   : > { %v894_v10 = vpop.xlane.xlu0 %893 }
 0x2f5   : > { %v908_v14 = vadd.f32 %v894_v10, %v820_v63 }
 0x2f7   : > { %917 = vst.msk [vmem:[#allocation3 + $0x8] sm:$0xff] %vm915_vm1, %v908_v14 }
 0x2f8   : > { %v896_v27 = vpop.xlane.xlu0 %895 }
 0x2f9   : > { %v909_v13 = vadd.f32 %v896_v27, %v821_v17 }
 0x2fb   : > { %918 = vst.msk [vmem:[#allocation3 + $0x10] sm:$0xff] %vm915_vm1, %v909_v13 }
 0x2fc   : > { %v898_v49 = vpop.xlane.xlu1 %897 }
 0x2fd   : > { %v910_v25 = vadd.f32 %v898_v49, %v822_v21 }
 0x2ff   : > { %919 = vst.msk [vmem:[#allocation3 + $0x18] sm:$0xff] %vm915_vm1, %v910_v25 }
 0x300   : > { %v900_v39 = vpop.xlane.xlu0 %899 }
 0x301   : > { %v911_v38 = vadd.f32 %v900_v39, %v823_v26 }
 0x303   : > { %920 = vst.msk [vmem:[#allocation3 + $0x20] sm:$0xff] %vm915_vm1, %v911_v38 }
 0x304   : > { %v902_v30 = vpop.xlane.xlu1 %901 }
 0x305   : > { %v912_v15 = vadd.f32 %v902_v30, %v824_v6 }
 0x307   : > { %921 = vst.msk [vmem:[#allocation3 + $0x28] sm:$0xff] %vm915_vm1, %v912_v15 }
 0x308   : > { %v904_v33 = vpop.xlane.xlu0 %903 }
 0x309   : > { %v913_v24 = vadd.f32 %v904_v33, %v825_v31 }
 0x30b   : > { %922 = vst.msk [vmem:[#allocation3 + $0x30] sm:$0xff] %vm915_vm1, %v913_v24 }
 0x30c   : > { %v906_v22 = vpop.xlane.xlu1 %905  ;;  %v1001_v34 = vpop.xlane.xlu0 %1000 }
 0x30d   : > { %v914_v54 = vadd.f32 %v906_v22, %v826_v35  ;;  %v1010_v62 = vadd.f32 %v1001_v34, %v986_v16 }
 0x30f   : > { %923 = vst.msk [vmem:[#allocation3 + $0x38] sm:$0xff] %vm915_vm1, %v914_v54  ;;  %1018 = vst.msk [vmem:[#allocation5 + $0x30] sm:$0xff] %vm915_vm1, %v1010_v62 }
 0x310   : > { %v1003_v40 = vpop.xlane.xlu1 %1002 }
 0x311   : > { %v1011_v45 = vadd.f32 %v1003_v40, %v987_v36 }
 0x313   : > { %1019 = vst.msk [vmem:[#allocation5 + $0x38] sm:$0xff] %vm915_vm1, %v1011_v45 }
 0x314 PF: > { %1022 = sbr.rel (!%p705_p0) target bundleno = 1243 (0x4db), region = 97  ;;  %1031 = vmax.xlane.f32.xlu0 (%p705_p0), %v2239_v0  ;;  %1035 = vmax.xlane.f32.xlu1 (%p705_p0), %v2235_v60  ;;  %v1943_v50 = vmov (%p705_p0), 0   ;;  %v2545_v46 = vld [vmem:[#allocation2] sm:$0xff] (%p705_p0)  ;;  %v2547_v58 = vld [vmem:[#allocation2 + $0x10] sm:$0xff] (%p705_p0)  ;;  %vm1183_vm2 = vcmask (%p705_p0), 7168   ;;  %v2555_v57 = vld [vmem:[#allocation2 + $0x8] sm:$0xff] (%p705_p0)  ;;  %v1208_v15 = vmul.f32 (%p705_p0), %v2216_v44, %v2239_v0  ;;  %v1210_v31 = vmul.f32 (%p705_p0), %v2214_v43, %v2235_v60 }
 0x315   : > { %1759 = vset.pattern.permute.xlu0 (%p705_p0), %v1943_v50  ;;  %1760 = vset.pattern.permute.xlu1 (%p705_p0), %v1943_v50  ;;  %v2557_v63 = vld [vmem:[#allocation2 + $0x18] sm:$0xff] (%p705_p0)  ;;  %v2574_v20 = vld [vmem:[#allocation2 + $0x20] sm:$0xff] (%p705_p0)  ;;  %v2576_v27 = vld [vmem:[#allocation2 + $0x28] sm:$0xff] (%p705_p0)  ;;  %v1212_v23 = vmul.f32 (%p705_p0), %v2224_v52, %v2241_v1  ;;  %v1214_v33 = vmul.f32 (%p705_p0), %v2228_v56, %v2237_v61  ;;  %v1209_v18 = vmul.f32 (%p705_p0), %v2220_v48, %v2247_v8 }
 0x316   : > { %v2593_v25 = vld [vmem:[#allocation2 + $0x30] sm:$0xff] (%p705_p0)  ;;  %v2595_v26 = vld [vmem:[#allocation2 + $0x38] sm:$0xff] (%p705_p0)  ;;  %v1211_v24 = vmul.f32 (%p705_p0), %v2218_v47, %v2243_v4  ;;  %v1213_v16 = vmul.f32 (%p705_p0), %v2222_v51, %v2249_v9  ;;  %v1215_v35 = vmul.f32 (%p705_p0), %v2226_v55, %v2245_v5 }
 0x318   : > { %1033 = vmax.xlane.f32.xlu0 (%p705_p0), %v2247_v8  ;;  %1037 = vmax.xlane.f32.xlu1 (%p705_p0), %v2243_v4 }
 0x31c   : > { %1039 = vmax.xlane.f32.xlu0 %v2241_v1  ;;  %1041 = vmax.xlane.f32.xlu1 %v2249_v9 }
 0x320   : > { %1043 = vmax.xlane.f32.xlu0 %v2237_v61  ;;  %1045 = vmax.xlane.f32.xlu1 %v2245_v5 }
 0x39d   : > { %v1032_v42 = vpop.xlane.xlu0 %1031  ;;  %v1036_v53 = vpop.xlane.xlu1 %1035 }
 0x39e   : > { %v2550_v59 = vmax.f32 %v2545_v46, %v1032_v42  ;;  %v2553_v2 = vmax.f32 %v2547_v58, %v1036_v53 }
 0x3a0   : > { %v1055_v3 = vsub.f32 %v2545_v46, %v2550_v59  ;;  %1192 = vst.msk [vmem:[#allocation2] sm:$0xff] %vm1183_vm2, %v2550_v59  ;;  %1097 = vperm.xlu0 %1759, %v2550_v59   ;;  %v1057_v10 = vsub.f32 %v2547_v58, %v2553_v2  ;;  %1194 = vst.msk [vmem:[#allocation2 + $0x10] sm:$0xff] %vm1183_vm2, %v2553_v2 }
 0x3a1   : > { %v1034_v11 = vpop.xlane.xlu0 %1033  ;;  %v1038_v14 = vpop.xlane.xlu1 %1037 }
 0x3a2   : > { %v2569_v7 = vmax.f32 %v2555_v57, %v1034_v11  ;;  %v2572_v17 = vmax.f32 %v2557_v63, %v1038_v14 }
 0x3a4   : > { %v1056_v32 = vsub.f32 %v2555_v57, %v2569_v7  ;;  %1193 = vst.msk [vmem:[#allocation2 + $0x8] sm:$0xff] %vm1183_vm2, %v2569_v7  ;;  %1102 = vperm.xlu1 %1760, %v2569_v7   ;;  %v1058_v13 = vsub.f32 %v2557_v63, %v2572_v17  ;;  %1195 = vst.msk [vmem:[#allocation2 + $0x18] sm:$0xff] %vm1183_vm2, %v2572_v17 }
 0x3a5   : > { %v1040_v21 = vpop.xlane.xlu0 %1039  ;;  %v1042_v29 = vpop.xlane.xlu1 %1041 }
 0x3a6   : > { %v2588_v49 = vmax.f32 %v2574_v20, %v1040_v21  ;;  %v2591_v37 = vmax.f32 %v2576_v27, %v1042_v29 }
 0x3a8   : > { %1107 = vperm.xlu1 %1760, %v2553_v2   ;;  %v1059_v19 = vsub.f32 %v2574_v20, %v2588_v49  ;;  %1196 = vst.msk [vmem:[#allocation2 + $0x20] sm:$0xff] %vm1183_vm2, %v2588_v49  ;;  %v1060_v39 = vsub.f32 %v2576_v27, %v2591_v37  ;;  %1197 = vst.msk [vmem:[#allocation2 + $0x28] sm:$0xff] %vm1183_vm2, %v2591_v37 }
 0x3a9   : > { %v1044_v41 = vpop.xlane.xlu0 %1043  ;;  %v1046_v38 = vpop.xlane.xlu1 %1045 }
 0x3aa   : > { %v2607_v6 = vmax.f32 %v2593_v25, %v1044_v41  ;;  %v2610_v28 = vmax.f32 %v2595_v26, %v1046_v38  ;;  %v1071_v46 = vmul.f32 1.442695, %v1059_v19  ;;  %v1073_v57 = vmul.f32 1.442695, %v1060_v39 }
 0x3ac   : > { %1112 = vperm.xlu1 %1760, %v2572_v17   ;;  %v1061_v30 = vsub.f32 %v2593_v25, %v2607_v6  ;;  %1198 = vst.msk [vmem:[#allocation2 + $0x30] sm:$0xff] %vm1183_vm2, %v2607_v6  ;;  %v1062_v12 = vsub.f32 %v2595_v26, %v2610_v28  ;;  %1199 = vst.msk [vmem:[#allocation2 + $0x38] sm:$0xff] %vm1183_vm2, %v2610_v28 }
 0x3ae   : > { %v1075_v63 = vmul.f32 1.442695, %v1061_v30  ;;  %v1077_v27 = vmul.f32 1.442695, %v1062_v12  ;;  %v1084_v12 = vld [vmem:[#allocation3 + $0x28] sm:$0xff] }
 0x3b0   : > { %1117 = vperm.xlu1 %1760, %v2588_v49   ;;  %v1081_v49 = vld [vmem:[#allocation3 + $0x10] sm:$0xff] }
 0x3b4   : > { %1122 = vperm.xlu1 %1760, %v2591_v37  }
 0x3b8   : > { %1127 = vperm.xlu1 %1760, %v2607_v6  }
 0x3bc   : > { %1132 = vperm.xlu1 %1760, %v2610_v28  }
 0x3bf   : > { %1216 = vadd.xlane.f32.xlu0 %v1208_v15 }
 0x3c3   : > { %1220 = vadd.xlane.f32.xlu0 %v1210_v31 }
 0x3c7   : > { %1224 = vadd.xlane.f32.xlu0 %v1212_v23 }
 0x3cb   : > { %1228 = vadd.xlane.f32.xlu0 %v1214_v33  ;;  %v1200_v33 = vld [vmem:[#allocation4] sm:$0xff] }
 0x3cf   : > { %1256 = vadd.xlane.f32.xlu0 %v2216_v44 }
 0x3d3   : > { %1260 = vadd.xlane.f32.xlu0 %v2214_v43 }
 0x3d7   : > { %1264 = vadd.xlane.f32.xlu0 %v2224_v52 }
 0x3e0   : > { %1218 = vadd.xlane.f32.xlu1 %v1209_v18 }
 0x3e4   : > { %1222 = vadd.xlane.f32.xlu1 %v1211_v24 }
 0x3e8   : > { %1226 = vadd.xlane.f32.xlu1 %v1213_v16  ;;  %v1202_v16 = vld [vmem:[#allocation4 + $0x10] sm:$0xff] }
 0x3ec   : > { %1230 = vadd.xlane.f32.xlu1 %v1215_v35 }
 0x3f0   : > { %1258 = vadd.xlane.f32.xlu1 %v2220_v48 }
 0x3f4   : > { %1262 = vadd.xlane.f32.xlu1 %v2218_v47 }
 0x3f8   : > { %1266 = vadd.xlane.f32.xlu1 %v2222_v51 }
 0x41b   : > { %v1098_v43 = vpop.permute.xlu0 %1097 }
 0x41c   : > { %v1135_v44 = vsub.f32 %v2239_v0, %v1098_v43  ;;  %v1204_v43 = vld [vmem:[#allocation4 + $0x20] sm:$0xff] }
 0x41e   : > { %v1143_v52 = vmul.f32 1.442695, %v1135_v44 }
 0x41f   : > { %v1103_v22 = vpop.permute.xlu1 %1102 }
 0x420   : > { %1761 = vpow2.f32 %v1143_v52  ;;  %v1136_v34 = vsub.f32 %v2247_v8, %v1103_v22  ;;  %v1206_v22 = vld [vmem:[#allocation4 + $0x30] sm:$0xff] }
 0x422   : > { %v1145_v54 = vmul.f32 1.442695, %v1136_v34 }
 0x423   : > { %v1108_v62 = vpop.permute.xlu1 %1107 }
 0x424   : > { %1763 = vpow2.f32 %v1145_v54  ;;  %v1137_v36 = vsub.f32 %v2235_v60, %v1108_v62  ;;  %v1248_v62 = vld [vmem:[#allocation5] sm:$0xff] }
 0x426   : > { %v1147_v40 = vmul.f32 1.442695, %v1137_v36 }
 0x427   : > { %v1113_v45 = vpop.permute.xlu1 %1112 }
 0x428   : > { %1765 = vpow2.f32 %v1147_v40  ;;  %v1138_v47 = vsub.f32 %v2243_v4, %v1113_v45  ;;  %v1250_v40 = vld [vmem:[#allocation5 + $0x10] sm:$0xff] }
 0x42a   : > { %v1149_v48 = vmul.f32 1.442695, %v1138_v47  ;;  %v1252_v47 = vld [vmem:[#allocation5 + $0x20] sm:$0xff] }
 0x42b   : > { %v1118_v51 = vpop.permute.xlu1 %1117 }
 0x42c   : > { %1767 = vpow2.f32 %v1149_v48  ;;  %v1139_v0 = vsub.f32 %v2241_v1, %v1118_v51 }
 0x42d   : > { %v1762_v50 = vpop.eup %1761 }
 0x42e   : > { %v1151_v42 = vmul.f32 1.442695, %v1139_v0  ;;  %1159 = vadd.xlane.f32.xlu1 %v1762_v50  ;;  %v1201_v0 = vld [vmem:[#allocation4 + $0x8] sm:$0xff] }
 0x42f   : > { %v1123_v53 = vpop.permute.xlu1 %1122 }
 0x430   : > { %1769 = vpow2.f32 %v1151_v42  ;;  %v1140_v8 = vsub.f32 %v2249_v9, %v1123_v53  ;;  %v1203_v53 = vld [vmem:[#allocation4 + $0x18] sm:$0xff] }
 0x431   : > { %v1764_v11 = vpop.eup %1763 }
 0x432   : > { %v1153_v14 = vmul.f32 1.442695, %v1140_v8  ;;  %1161 = vadd.xlane.f32.xlu0 %v1764_v11 }
 0x433   : > { %v1128_v60 = vpop.permute.xlu1 %1127 }
 0x434   : > { %1771 = vpow2.f32 %v1153_v14  ;;  %v1141_v21 = vsub.f32 %v2237_v61, %v1128_v60  ;;  %v1205_v14 = vld [vmem:[#allocation4 + $0x28] sm:$0xff] }
 0x435   : > { %v1766_v4 = vpop.eup %1765 }
 0x436   : > { %v1155_v29 = vmul.f32 1.442695, %v1141_v21  ;;  %1163 = vadd.xlane.f32.xlu0 %v1766_v4  ;;  %v1207_v4 = vld [vmem:[#allocation4 + $0x38] sm:$0xff] }
 0x437   : > { %v1133_v41 = vpop.permute.xlu1 %1132 }
 0x438   : > { %1773 = vpow2.f32 %v1155_v29  ;;  %v1142_v1 = vsub.f32 %v2245_v5, %v1133_v41 }
 0x439   : > { %v1768_v38 = vpop.eup %1767 }
 0x43a   : > { %v1157_v15 = vmul.f32 1.442695, %v1142_v1  ;;  %1165 = vadd.xlane.f32.xlu1 %v1768_v38  ;;  %v1249_v1 = vld [vmem:[#allocation5 + $0x8] sm:$0xff] }
 0x43c   : > { %1775 = vpow2.f32 %v1157_v15 }
 0x43d   : > { %v1770_v31 = vpop.eup %1769 }
 0x43e   : > { %1167 = vadd.xlane.f32.xlu0 %v1770_v31  ;;  %v1251_v31 = vld [vmem:[#allocation5 + $0x18] sm:$0xff] }
 0x441   : > { %v1772_v9 = vpop.eup %1771 }
 0x442   : > { %1169 = vadd.xlane.f32.xlu1 %v1772_v9 }
 0x445   : > { %v1774_v23 = vpop.eup %1773 }
 0x446   : > { %1171 = vadd.xlane.f32.xlu0 %v1774_v23 }
 0x448   : > { %v1217_v18 = vpop.xlane.xlu0 %1216 }
 0x449   : > { %v1776_v61 = vpop.eup %1775  ;;  %v1232_v24 = vadd.f32 %v1217_v18, %v1200_v33  ;;  %v1253_v33 = vld [vmem:[#allocation5 + $0x28] sm:$0xff] }
 0x44a   : > { %1173 = vadd.xlane.f32.xlu1 %v1776_v61  ;;  %1268 = vadd.xlane.f32.xlu0 %v2228_v56 }
 0x44b   : > { %1240 = vst.msk [vmem:[#allocation4] sm:$0xff] %vm1183_vm2, %v1232_v24  ;;  %v1063_v24 = vmul.f32 1.442695, %v1055_v3  ;;  %v1079_v3 = vld [vmem:[#allocation3] sm:$0xff] }
 0x44c   : > { %v1221_v5 = vpop.xlane.xlu0 %1220 }
 0x44d   : > { %v1234_v35 = vadd.f32 %v1221_v5, %v1202_v16  ;;  %1777 = vpow2.f32 %v1063_v24  ;;  %v1065_v16 = vmul.f32 1.442695, %v1056_v32  ;;  %v1067_v5 = vmul.f32 1.442695, %v1057_v10  ;;  %v1080_v10 = vld [vmem:[#allocation3 + $0x8] sm:$0xff] }
 0x44e   : > { %1270 = vadd.xlane.f32.xlu1 %v2226_v55 }
 0x44f   : > { %1242 = vst.msk [vmem:[#allocation4 + $0x10] sm:$0xff] %vm1183_vm2, %v1234_v35  ;;  %1779 = vpow2.f32 %v1065_v16  ;;  %v1069_v35 = vmul.f32 1.442695, %v1058_v13 }
 0x450   : > { %v1225_v44 = vpop.xlane.xlu0 %1224  ;;  %1781 = vpow2.f32 %v1067_v5 }
 0x451   : > { %v1236_v52 = vadd.f32 %v1225_v44, %v1204_v43  ;;  %1783 = vpow2.f32 %v1069_v35  ;;  %v1082_v44 = vld [vmem:[#allocation3 + $0x18] sm:$0xff] }
 0x452   : > { %1785 = vpow2.f32 %v1071_v46 }
 0x453   : > { %1244 = vst.msk [vmem:[#allocation4 + $0x20] sm:$0xff] %vm1183_vm2, %v1236_v52  ;;  %1787 = vpow2.f32 %v1073_v57 }
 0x454   : > { %v1229_v34 = vpop.xlane.xlu0 %1228  ;;  %1789 = vpow2.f32 %v1075_v63 }
 0x455   : > { %v1238_v54 = vadd.f32 %v1229_v34, %v1206_v22  ;;  %1791 = vpow2.f32 %v1077_v27  ;;  %v1083_v22 = vld [vmem:[#allocation3 + $0x20] sm:$0xff] }
 0x457   : > { %1246 = vst.msk [vmem:[#allocation4 + $0x30] sm:$0xff] %vm1183_vm2, %v1238_v54 }
 0x458   : > { %v1257_v56 = vpop.xlane.xlu0 %1256 }
 0x459   : > { %v1272_v36 = vadd.f32 %v1257_v56, %v1248_v62 }
 0x45a   : > { %v1778_v59 = vpop.eup %1777 }
 0x45b   : > { %1280 = vst.msk [vmem:[#allocation5] sm:$0xff] %vm1183_vm2, %v1272_v36  ;;  %v1087_v7 = vmul.f32 %v1778_v59, %v1079_v3 }
 0x45c   : > { %v1261_v45 = vpop.xlane.xlu0 %1260  ;;  %v1780_v58 = vpop.eup %1779 }
 0x45d   : > { %v1274_v55 = vadd.f32 %v1261_v45, %v1250_v40  ;;  %v1088_v17 = vmul.f32 %v1780_v58, %v1080_v10  ;;  %v1782_v20 = vpop.eup %1781  ;;  %v1085_v45 = vld [vmem:[#allocation3 + $0x30] sm:$0xff] }
 0x45e   : > { %v1089_v37 = vmul.f32 %v1782_v20, %v1081_v49  ;;  %v1784_v39 = vpop.eup %1783 }
 0x45f   : > { %1282 = vst.msk [vmem:[#allocation5 + $0x10] sm:$0xff] %vm1183_vm2, %v1274_v55  ;;  %v1090_v6 = vmul.f32 %v1784_v39, %v1082_v44  ;;  %v1786_v30 = vpop.eup %1785 }
 0x460   : > { %v1265_v48 = vpop.xlane.xlu0 %1264  ;;  %v1091_v54 = vmul.f32 %v1786_v30, %v1083_v22  ;;  %v1788_v26 = vpop.eup %1787 }
 0x461   : > { %v1276_v51 = vadd.f32 %v1265_v48, %v1252_v47  ;;  %v1092_v56 = vmul.f32 %v1788_v26, %v1084_v12  ;;  %v1790_v36 = vpop.eup %1789 }
 0x462   : > { %v1093_v47 = vmul.f32 %v1790_v36, %v1085_v45  ;;  %v1792_v48 = vpop.eup %1791 }
 0x463   : > { %1284 = vst.msk [vmem:[#allocation5 + $0x20] sm:$0xff] %vm1183_vm2, %v1276_v51 }
 0x469   : > { %v1219_v50 = vpop.xlane.xlu1 %1218 }
 0x46a   : > { %v1233_v42 = vadd.f32 %v1219_v50, %v1201_v0  ;;  %v1086_v0 = vld [vmem:[#allocation3 + $0x38] sm:$0xff] }
 0x46c   : > { %1241 = vst.msk [vmem:[#allocation4 + $0x8] sm:$0xff] %vm1183_vm2, %v1233_v42  ;;  %v1254_v42 = vld [vmem:[#allocation5 + $0x30] sm:$0xff] }
 0x46d   : > { %v1223_v8 = vpop.xlane.xlu1 %1222 }
 0x46e   : > { %v1235_v11 = vadd.f32 %v1223_v8, %v1203_v53  ;;  %v1094_v53 = vmul.f32 %v1792_v48, %v1086_v0 }
 0x470   : > { %1243 = vst.msk [vmem:[#allocation4 + $0x18] sm:$0xff] %vm1183_vm2, %v1235_v11 }
 0x471   : > { %v1227_v60 = vpop.xlane.xlu1 %1226 }
 0x472   : > { %v1237_v21 = vadd.f32 %v1227_v60, %v1205_v14 }
 0x474   : > { %1245 = vst.msk [vmem:[#allocation4 + $0x28] sm:$0xff] %vm1183_vm2, %v1237_v21  ;;  %v1255_v21 = vld [vmem:[#allocation5 + $0x38] sm:$0xff] }
 0x475   : > { %v1231_v29 = vpop.xlane.xlu1 %1230 }
 0x476   : > { %v1239_v41 = vadd.f32 %v1231_v29, %v1207_v4 }
 0x478   : > { %1247 = vst.msk [vmem:[#allocation4 + $0x38] sm:$0xff] %vm1183_vm2, %v1239_v41 }
 0x479   : > { %v1259_v38 = vpop.xlane.xlu1 %1258 }
 0x47a   : > { %v1273_v15 = vadd.f32 %v1259_v38, %v1249_v1 }
 0x47c   : > { %1281 = vst.msk [vmem:[#allocation5 + $0x8] sm:$0xff] %vm1183_vm2, %v1273_v15 }
 0x47d   : > { %v1263_v9 = vpop.xlane.xlu1 %1262 }
 0x47e   : > { %v1275_v23 = vadd.f32 %v1263_v9, %v1251_v31 }
 0x480   : > { %1283 = vst.msk [vmem:[#allocation5 + $0x18] sm:$0xff] %vm1183_vm2, %v1275_v23 }
 0x481   : > { %v1267_v18 = vpop.xlane.xlu1 %1266 }
 0x482   : > { %v1277_v61 = vadd.f32 %v1267_v18, %v1253_v33 }
 0x484   : > { %1285 = vst.msk [vmem:[#allocation5 + $0x28] sm:$0xff] %vm1183_vm2, %v1277_v61 }
 0x4b7   : > { %v1160_v2 = vpop.xlane.xlu1 %1159 }
 0x4b8   : > { %v1175_v32 = vadd.f32 %v1160_v2, %v1087_v7 }
 0x4ba   : > { %1184 = vst.msk [vmem:[#allocation3] sm:$0xff] %vm1183_vm2, %v1175_v32 }
 0x4bb   : > { %v1162_v13 = vpop.xlane.xlu0 %1161 }
 0x4bc   : > { %v1176_v19 = vadd.f32 %v1162_v13, %v1088_v17 }
 0x4be   : > { %1185 = vst.msk [vmem:[#allocation3 + $0x8] sm:$0xff] %vm1183_vm2, %v1176_v19 }
 0x4bf   : > { %v1164_v43 = vpop.xlane.xlu0 %1163 }
 0x4c0   : > { %v1177_v25 = vadd.f32 %v1164_v43, %v1089_v37 }
 0x4c2   : > { %1186 = vst.msk [vmem:[#allocation3 + $0x10] sm:$0xff] %vm1183_vm2, %v1177_v25 }
 0x4c3   : > { %v1166_v52 = vpop.xlane.xlu1 %1165 }
 0x4c4   : > { %v1178_v34 = vadd.f32 %v1166_v52, %v1090_v6 }
 0x4c6   : > { %1187 = vst.msk [vmem:[#allocation3 + $0x18] sm:$0xff] %vm1183_vm2, %v1178_v34 }
 0x4c7   : > { %v1168_v28 = vpop.xlane.xlu0 %1167 }
 0x4c8   : > { %v1179_v62 = vadd.f32 %v1168_v28, %v1091_v54 }
 0x4ca   : > { %1188 = vst.msk [vmem:[#allocation3 + $0x20] sm:$0xff] %vm1183_vm2, %v1179_v62 }
 0x4cb   : > { %v1170_v40 = vpop.xlane.xlu1 %1169 }
 0x4cc   : > { %v1180_v55 = vadd.f32 %v1170_v40, %v1092_v56 }
 0x4ce   : > { %1189 = vst.msk [vmem:[#allocation3 + $0x28] sm:$0xff] %vm1183_vm2, %v1180_v55 }
 0x4cf   : > { %v1172_v51 = vpop.xlane.xlu0 %1171 }
 0x4d0   : > { %v1181_v50 = vadd.f32 %v1172_v51, %v1093_v47 }
 0x4d2   : > { %1190 = vst.msk [vmem:[#allocation3 + $0x30] sm:$0xff] %vm1183_vm2, %v1181_v50 }
 0x4d3   : > { %v1174_v8 = vpop.xlane.xlu1 %1173  ;;  %v1269_v11 = vpop.xlane.xlu0 %1268 }
 0x4d4   : > { %v1182_v14 = vadd.f32 %v1174_v8, %v1094_v53  ;;  %v1278_v60 = vadd.f32 %v1269_v11, %v1254_v42 }
 0x4d6   : > { %1191 = vst.msk [vmem:[#allocation3 + $0x38] sm:$0xff] %vm1183_vm2, %v1182_v14  ;;  %1286 = vst.msk [vmem:[#allocation5 + $0x30] sm:$0xff] %vm1183_vm2, %v1278_v60 }
 0x4d7   : > { %v1271_v4 = vpop.xlane.xlu1 %1270 }
 0x4d8   : > { %v1279_v29 = vadd.f32 %v1271_v4, %v1255_v21 }
 0x4da   : > { %1287 = vst.msk [vmem:[#allocation5 + $0x38] sm:$0xff] %vm1183_vm2, %v1279_v29 }
 0x4db PF: > { %p1565_p1 = scmp.ne.s32.totalorder %s1917_s23, 1 }
 0x4dd   : > { %1291 = sbr.rel (%p1565_p1) target bundleno = 1289 (0x509), region = 101 }
 0x4e2   : > { %v1300_v41 = vld [vmem:[#allocation3] sm:$0xff]  ;;  %v1301_v1 = vld [vmem:[#allocation3 + $0x8] sm:$0xff]  ;;  %v1302_v15 = vld [vmem:[#allocation3 + $0x10] sm:$0xff]  ;;  %vm1388_vm3 = vcmask 7168  }
 0x4e3   : > { %1793 = vlog2.f32 %v1300_v41  ;;  %v1340_v38 = vld [vmem:[#allocation5] sm:$0xff]  ;;  %v1303_v31 = vld [vmem:[#allocation3 + $0x18] sm:$0xff]  ;;  %v1341_v9 = vld [vmem:[#allocation5 + $0x8] sm:$0xff] }
 0x4e4   : > { %1795 = vlog2.f32 %v1301_v1  ;;  %v1304_v23 = vld [vmem:[#allocation3 + $0x20] sm:$0xff]  ;;  %v1342_v33 = vld [vmem:[#allocation5 + $0x10] sm:$0xff]  ;;  %v1305_v18 = vld [vmem:[#allocation3 + $0x28] sm:$0xff] }
 0x4e5   : > { %1797 = vlog2.f32 %v1302_v15  ;;  %v1343_v61 = vld [vmem:[#allocation5 + $0x18] sm:$0xff]  ;;  %v1306_v24 = vld [vmem:[#allocation3 + $0x30] sm:$0xff]  ;;  %v1344_v5 = vld [vmem:[#allocation5 + $0x20] sm:$0xff] }
 0x4e6   : > { %1799 = vrcp.f32 %v1340_v38  ;;  %v1307_v16 = vld [vmem:[#allocation3 + $0x38] sm:$0xff]  ;;  %v1292_v46 = vld [vmem:[#allocation2] sm:$0xff]  ;;  %v2706_v3 = vld [vmem:[#allocation5 + $0x28] sm:$0xff] }
 0x4e7   : > { %1801 = vlog2.f32 %v1303_v31  ;;  %v1293_v7 = vld [vmem:[#allocation2 + $0x8] sm:$0xff]  ;;  %v2708_v58 = vld [vmem:[#allocation5 + $0x30] sm:$0xff]  ;;  %v2710_v32 = vld [vmem:[#allocation5 + $0x38] sm:$0xff] }
 0x4e8   : > { %1803 = vrcp.f32 %v1341_v9  ;;  %v1332_v17 = vld [vmem:[#allocation4] sm:$0xff]  ;;  %v1294_v20 = vld [vmem:[#allocation2 + $0x10] sm:$0xff]  ;;  %v1333_v39 = vld [vmem:[#allocation4 + $0x8] sm:$0xff] }
 0x4e9   : > { %1805 = vlog2.f32 %v1304_v23  ;;  %v1295_v43 = vld [vmem:[#allocation2 + $0x18] sm:$0xff]  ;;  %v1334_v34 = vld [vmem:[#allocation4 + $0x10] sm:$0xff]  ;;  %v1296_v56 = vld [vmem:[#allocation2 + $0x20] sm:$0xff] }
 0x4ea   : > { %1807 = vrcp.f32 %v1342_v33  ;;  %v1335_v40 = vld [vmem:[#allocation4 + $0x18] sm:$0xff]  ;;  %v1297_v50 = vld [vmem:[#allocation2 + $0x28] sm:$0xff]  ;;  %v1298_v11 = vld [vmem:[#allocation2 + $0x30] sm:$0xff] }
 0x4eb   : > { %1809 = vlog2.f32 %v1305_v18  ;;  %v1336_v4 = vld [vmem:[#allocation4 + $0x20] sm:$0xff]  ;;  %v1299_v15 = vld [vmem:[#allocation2 + $0x38] sm:$0xff] }
 0x4ec   : > { %1811 = vrcp.f32 %v1343_v61 }
 0x4ed   : > { %1813 = vlog2.f32 %v1306_v24 }
 0x4ee   : > { %1815 = vlog2.f32 %v1307_v16 }
 0x4ef   : > { %1817 = vrcp.f32 %v1344_v5 }
 0x4f0   : > { %v1794_v35 = vpop.eup %1793  ;;  %1819 = vrcp.f32 %v2706_v3 }
 0x4f1   : > { %v1309_v59 = vmul.f32 0.6931472, %v1794_v35  ;;  %v1796_v57 = vpop.eup %1795  ;;  %1821 = vrcp.f32 %v2708_v58  ;;  %v1338_v35 = vld [vmem:[#allocation4 + $0x30] sm:$0xff] }
 0x4f2   : > { %v1311_v10 = vmul.f32 0.6931472, %v1796_v57  ;;  %v1798_v63 = vpop.eup %1797  ;;  %1823 = vrcp.f32 %v2710_v32 }
 0x4f3   : > { %v1324_v2 = vadd.f32 %v1309_v59, %v1292_v46  ;;  %v1800_v13 = vpop.eup %1799  ;;  %v1313_v27 = vmul.f32 0.6931472, %v1798_v63  ;;  %v1339_v63 = vld [vmem:[#allocation4 + $0x38] sm:$0xff] }
 0x4f4   : > { %v1325_v19 = vadd.f32 %v1311_v10, %v1293_v7  ;;  %v1802_v37 = vpop.eup %1801 }
 0x4f5   : > { %v1348_v49 = vmul.f32 %v1340_v38, %v1324_v2  ;;  %v1804_v44 = vpop.eup %1803  ;;  %v1326_v30 = vadd.f32 %v1313_v27, %v1294_v20  ;;  %v1315_v52 = vmul.f32 0.6931472, %v1802_v37 }
 0x4f6   : > { %v1349_v6 = vmul.f32 %v1341_v9, %v1325_v19  ;;  %v1806_v22 = vpop.eup %1805 }
 0x4f7   : > { %v1356_v25 = vsub.f32 %v1332_v17, %v1348_v49  ;;  %v1808_v54 = vpop.eup %1807  ;;  %v1350_v12 = vmul.f32 %v1342_v33, %v1326_v30  ;;  %v1327_v62 = vadd.f32 %v1315_v52, %v1295_v43  ;;  %v1317_v45 = vmul.f32 0.6931472, %v1806_v22  ;;  %v1337_v33 = vld [vmem:[#allocation4 + $0x28] sm:$0xff] }
 0x4f8   : > { %v1357_v28 = vsub.f32 %v1333_v39, %v1349_v6  ;;  %v1810_v36 = vpop.eup %1809 }
 0x4f9   : > { %v1365_v26 = vmul.f32 %v1800_v13, %v1356_v25  ;;  %v1812_v55 = vpop.eup %1811  ;;  %v1358_v51 = vsub.f32 %v1334_v34, %v1350_v12  ;;  %v1351_v0 = vmul.f32 %v1343_v61, %v1327_v62  ;;  %v1328_v53 = vadd.f32 %v1317_v45, %v1296_v56 }
 0x4fa   : > { %v1367_v48 = vmul.f32 %v1804_v44, %v1357_v28  ;;  %v1814_v42 = vpop.eup %1813  ;;  %v1319_v8 = vmul.f32 0.6931472, %v1810_v36 }
 0x4fb   : > { %v1380_v47 = vmul.f32 -1.0, %v1365_v26  ;;  %v1369_v60 = vmul.f32 %v1808_v54, %v1358_v51  ;;  %v1359_v21 = vsub.f32 %v1335_v40, %v1351_v0  ;;  %v1321_v29 = vmul.f32 0.6931472, %v1814_v42  ;;  %v1816_v41 = vpop.eup %1815 }
 0x4fc   : > { %v1381_v14 = vmul.f32 -1.0, %v1367_v48  ;;  %v1352_v1 = vmul.f32 %v1344_v5, %v1328_v53  ;;  %v1329_v38 = vadd.f32 %v1319_v8, %v1297_v50  ;;  %v1818_v31 = vpop.eup %1817  ;;  %v1323_v61 = vmul.f32 0.6931472, %v1816_v41 }
 0x4fd   : > { %1389 = vst.msk [vmem:[%s2130_s10] sm:$0xff] %vm1388_vm3, %v1380_v47  ;;  %v1382_v9 = vmul.f32 -1.0, %v1369_v60  ;;  %v1371_v23 = vmul.f32 %v1812_v55, %v1359_v21  ;;  %v1330_v18 = vadd.f32 %v1321_v29, %v1298_v11  ;;  %v1820_v46 = vpop.eup %1819 }
 0x4fe   : > { %1390 = vst.msk [vmem:[%s2130_s10 + $0x8] sm:$0xff] %vm1388_vm3, %v1381_v14  ;;  %v1360_v24 = vsub.f32 %v1336_v4, %v1352_v1  ;;  %v1353_v16 = vmul.f32 %v2706_v3, %v1329_v38  ;;  %v1331_v57 = vadd.f32 %v1323_v61, %v1299_v15  ;;  %v1822_v7 = vpop.eup %1821 }
 0x4ff   : > { %1391 = vst.msk [vmem:[%s2130_s10 + $0x10] sm:$0xff] %vm1388_vm3, %v1382_v9  ;;  %v1383_v5 = vmul.f32 -1.0, %v1371_v23  ;;  %v1354_v59 = vmul.f32 %v2708_v58, %v1330_v18  ;;  %v1824_v17 = vpop.eup %1823 }
 0x500   : > { %v1373_v2 = vmul.f32 %v1818_v31, %v1360_v24  ;;  %v1361_v10 = vsub.f32 %v1337_v33, %v1353_v16  ;;  %v1355_v20 = vmul.f32 %v2710_v32, %v1331_v57 }
 0x501   : > { %1392 = vst.msk [vmem:[%s2130_s10 + $0x18] sm:$0xff] %vm1388_vm3, %v1383_v5  ;;  %v1362_v3 = vsub.f32 %v1338_v35, %v1354_v59 }
 0x502   : > { %v1384_v13 = vmul.f32 -1.0, %v1373_v2  ;;  %v1375_v49 = vmul.f32 %v1820_v46, %v1361_v10  ;;  %v1363_v27 = vsub.f32 %v1339_v63, %v1355_v20 }
 0x503   : > { %v1377_v19 = vmul.f32 %v1822_v7, %v1362_v3 }
 0x504   : > { %1393 = vst.msk [vmem:[%s2130_s10 + $0x20] sm:$0xff] %vm1388_vm3, %v1384_v13  ;;  %v1385_v58 = vmul.f32 -1.0, %v1375_v49  ;;  %v1379_v39 = vmul.f32 %v1824_v17, %v1363_v27 }
 0x505   : > { %v1386_v37 = vmul.f32 -1.0, %v1377_v19 }
 0x506   : > { %1394 = vst.msk [vmem:[%s2130_s10 + $0x28] sm:$0xff] %vm1388_vm3, %v1385_v58  ;;  %v1387_v43 = vmul.f32 -1.0, %v1379_v39 }
 0x507   : > { %1395 = vst.msk [vmem:[%s2130_s10 + $0x30] sm:$0xff] %vm1388_vm3, %v1386_v37 }
 0x508   : > { %1396 = vst.msk [vmem:[%s2130_s10 + $0x38] sm:$0xff] %vm1388_vm3, %v1387_v43 }
 0x509 PF: > { %s18_s27 = sadd.s32 1, %s1933_s27   ;;  %s2783_s23 = sld [smem:[#allocation12_spill]] }
 0x50a   : > { %p15_p2 = scmp.ge.s32.totalorder %s18_s27, 8   ;;  %s2784_s16 = sld [smem:[#allocation13_spill]] }
 0x50b   : > { %s2785_s6 = sld [smem:[#allocation10_spill]]  ;;  %s2787_s18 = smov %s1901_s19 }
 0x50c   : > { %s2786_s30 = sld [smem:[#allocation11_spill]]  ;;  %s2789_s20 = smov %s1909_s21 }
 0x50d   : > { %s2790_s21 = smov %s1913_s22  ;;  %s2793_s24 = smov %s1929_s26 }
 0x50e   :  { %17 = sbr.rel (!%p15_p2) target bundleno = 8 (0x8), region = 154 }
 0x50f   : > { %s2788_s19 = smov %s2783_s23  ;;  %s2792_s23 = smov %s1925_s25 }
 0x510   : > { %s2791_s22 = smov %s2784_s16 }
 0x511   : > { %s2794_s25 = smov %s2785_s6 }
 0x512   : > { %s2795_s26 = smov %s2786_s30 }
 0x513   :  { %1419 = vsyncpa [#allocation7], 1 }
 0x514   :  { %1421 = vsyncpa [#allocation7 + $0x1], 1 }

</bundles_post_ra>
